<compile_context>
chip_gen: v6e
topology: v6e:2x2x1
jax: 0.10.0
libtpu: 0.0.40
codegen_flags: <defaults>
</compile_context>

<pallas_src>
import jax
import jax.numpy as jnp
from jax.experimental import pallas as pl
from jax.experimental.pallas import tpu as pltpu

_R = 128  # batch elements packed per row -> lane-dense input and output blocks


def _deep_sets_kernel(x_ref, w_ref, b_ref, o_ref):
    # x_ref: (TG, R*N*F) VMEM   w_ref: (R*N*F, R) VMEM (block-diag, 1/N folded in)
    # b_ref: (1, 1) SMEM        o_ref: (TG, R) VMEM
    acc = jnp.dot(x_ref[...], w_ref[...], preferred_element_type=jnp.float32)
    o_ref[...] = (acc + b_ref[0, 0]).astype(o_ref.dtype)


def deep_sets_forward(x, rho_w, rho_b, *, row_block=256):
    """Deep_Sets.forward: rho(mean(x, axis=1)).squeeze(-1).

    x: (B, N, F) f32; rho_w: (F, 1) (torch weight transposed); rho_b: (1, 1).
    Returns (B,) f32.
    Note: torch's .squeeze() would return a 0-d tensor for B == 1; we always
    return shape (B,).
    """
    B, N, F = x.shape
    NF = N * F
    R = _R

    # ---- parameter prep (tiny, independent of B) ---------------------------
    # Fold the mean over the set axis into the rho weight.
    w_eff = jnp.tile(rho_w.astype(jnp.float32) / N, (N, 1))          # (NF, 1)
    # Block-diagonal weight: w_block[r*NF + k, c] = (r == c) * w_eff[k]
    # so one lane-dense dot reduces R batch elements at once.
    w_block = jnp.kron(jnp.eye(R, dtype=jnp.float32), w_eff)         # (R*NF, R)
    b_smem = jnp.reshape(rho_b.astype(jnp.float32), (1, 1))

    # ---- pack R batch elements per row (free contiguous reshape) -----------
    x2 = x.reshape(B, NF)
    B_pad = ((B + R - 1) // R) * R
    if B_pad != B:
        # TODO(synk): this pad copies x once; choose B as a multiple of 128 to avoid it.
        x2 = jnp.pad(x2, ((0, B_pad - B), (0, 0)))
    G = B_pad // R
    x_packed = x2.reshape(G, R * NF)

    tg = min(row_block, G)           # (tg, R*NF): tg % 8 == 0 or tg == G  -> legal block
    grid = (pl.cdiv(G, tg),)

    out = pl.pallas_call(
        _deep_sets_kernel,
        out_shape=jax.ShapeDtypeStruct((G, R), jnp.float32),
        grid=grid,
        in_specs=[
            pl.BlockSpec((tg, R * NF), lambda i: (i, 0)),        # streamed batch tiles
            pl.BlockSpec((R * NF, R), lambda i: (0, 0)),         # resident weight
            pl.BlockSpec(memory_space=pltpu.MemorySpace.SMEM),   # scalar bias
        ],
        out_specs=pl.BlockSpec((tg, R), lambda i: (i, 0)),
        compiler_params=pltpu.CompilerParams(
            dimension_semantics=("parallel",),
            vmem_limit_bytes=32 * 1024 * 1024,
        ),
    )(x_packed, w_block, b_smem)

    # (G, R) -> (B_pad,) is a free contiguous reshape; drop the pad tail.
    return out.reshape(B_pad)[:B]


if __name__ == "__main__":
    N, F = 8, 4
    key = jax.random.PRNGKey(0)
    kx1, kx2, kw, kb = jax.random.split(key, 4)

    # Rho = nn.Linear(4, 1): default torch init ~ U(-1/sqrt(4), 1/sqrt(4)).
    # (Phi's parameters are intentionally omitted: Deep_Sets.forward never calls self.phi.)
    bound = 0.5
    rho_w = jax.random.uniform(kw, (F, 1), jnp.float32, -bound, bound)
    rho_b = jax.random.uniform(kb, (1, 1), jnp.float32, -bound, bound)

    fwd = jax.jit(deep_sets_forward)

    for kx, B in ((kx1, 2048), (kx2, 1000)):   # B=1000 exercises the pad/mask tail
        x = jax.random.normal(kx, (B, N, F), jnp.float32)
        out = jax.block_until_ready(fwd(x, rho_w, rho_b))
        ref = (jnp.mean(x, axis=1) @ rho_w + rho_b)[:, 0]
        assert out.shape == (B,)
        assert jnp.allclose(out, ref, atol=2e-5, rtol=1e-5), (
            B, float(jnp.max(jnp.abs(out - ref))))

    print("KERNEL_OK")
</pallas_src>

<mosaic_0001>
module attributes {stable_mosaic.version = 11 : i64} {
  func.func @_deep_sets_kernel(%arg0: i32, %arg1: memref<16x4096xf32, #tpu.memory_space<vmem>>, %arg2: memref<4096x128xf32, #tpu.memory_space<vmem>>, %arg3: memref<1x1xf32, #tpu.memory_space<smem>>, %arg4: memref<16x128xf32, #tpu.memory_space<vmem>>) attributes {dimension_semantics = [#tpu.dimension_semantics<parallel>], iteration_bounds = array<i64: 1>, scalar_prefetch = 0 : i64, scratch_operands = 0 : i64, tpu.core_type = #tpu.core_type<tc>, window_params = [{transform_indices = @transform_0, window_bounds = array<i64: 16, 4096>}, {pipeline_mode = #tpu.pipeline_mode<synchronous>, transform_indices = @transform_1, window_bounds = array<i64: 4096, 128>}, {transform_indices = @transform_2, window_bounds = array<i64: 1, 1>}, {transform_indices = @transform_3, window_bounds = array<i64: 16, 128>}]} {
    %c0 = arith.constant 0 : index
    %c0_0 = arith.constant 0 : index
    %0 = vector.load %arg1[%c0, %c0_0] : memref<16x4096xf32, #tpu.memory_space<vmem>>, vector<16x4096xf32>
    %c0_1 = arith.constant 0 : index
    %c0_2 = arith.constant 0 : index
    %1 = vector.load %arg2[%c0_1, %c0_2] : memref<4096x128xf32, #tpu.memory_space<vmem>>, vector<4096x128xf32>
    %cst = arith.constant dense<0.000000e+00> : vector<16x128xf32>
    %2 = tpu.matmul %0, %1, %cst {dimension_numbers = #tpu.dot_dimension_numbers<[1], [0], [0], [1], [0, 0, 1, 1], [], []>} : vector<16x4096xf32>, vector<4096x128xf32>, vector<16x128xf32> -> vector<16x128xf32>
    %c0_3 = arith.constant 0 : index
    %c0_4 = arith.constant 0 : index
    %3 = memref.load %arg3[%c0_3, %c0_4] : memref<1x1xf32, #tpu.memory_space<smem>>
    %4 = vector.broadcast %3 : f32 to vector<16x128xf32>
    %5 = arith.addf %2, %4 : vector<16x128xf32>
    %c0_5 = arith.constant 0 : index
    %c0_6 = arith.constant 0 : index
    %6 = vector.load %arg4[%c0_5, %c0_6] : memref<16x128xf32, #tpu.memory_space<vmem>>, vector<16x128xf32>
    tpu.vector_store %arg4[%c0_5, %c0_6], %5 {strides = array<i32>} : memref<16x128xf32, #tpu.memory_space<vmem>>, vector<16x128xf32>,
    return
  }
  func.func @transform_0(%arg0: i32) -> (i32, i32) {
    %c0_i32 = arith.constant 0 : i32
    %c0_i32_0 = arith.constant 0 : i32
    return %arg0, %c0_i32 : i32, i32
  }
  func.func @transform_1(%arg0: i32) -> (i32, i32) {
    %c0_i32 = arith.constant 0 : i32
    %c0_i32_0 = arith.constant 0 : i32
    %c0_i32_1 = arith.constant 0 : i32
    return %c0_i32, %c0_i32_0 : i32, i32
  }
  func.func @transform_2(%arg0: i32) -> (i32, i32) {
    %c0_i32 = arith.constant 0 : i32
    %c0_i32_0 = arith.constant 0 : i32
    %c0_i32_1 = arith.constant 0 : i32
    return %c0_i32, %c0_i32_0 : i32, i32
  }
  func.func @transform_3(%arg0: i32) -> (i32, i32) {
    %c0_i32 = arith.constant 0 : i32
    %c0_i32_0 = arith.constant 0 : i32
    return %arg0, %c0_i32 : i32, i32
  }
}

</mosaic_0001>

<bundles_post_ra>
// kernel: deep_sets_forward.1
= control target key start
LH: loop header
LB: loop body
LE: loop exit
PB: predicated region body
PF: predicated region fallthrough
CT: control target
= control target key end

     0   :  { %s4202_s0 = inlined_call_operand.vmem [shape: f32[16,4096], index: 0, kind: input, shape index: {}]   ;;  %s4203_s1 = inlined_call_operand.vmem [shape: f32[4096,128], index: 1, kind: input, shape index: {}]   ;;  %s4204_s2 = inlined_call_operand.<no memory space> [shape: f32[1,1], index: 2, kind: input, shape index: {}]   ;;  %s4205_s3 = inlined_call_operand.hbm [shape: f32[16,128], index: 3, kind: output, shape index: {}]  }
   0x1   :  { %v111_v0 = vld [vmem:[%s4203_s1 + $0xf8] sm:$0xff]  ;;  %v110_v4 = vld [vmem:[%s4203_s1 + $0xf0] sm:$0xff]  ;;  %v109_v8 = vld [vmem:[%s4203_s1 + $0xe8] sm:$0xff] }
   0x2   :  { %v143_v1 = vld [vmem:[%s4203_s1 + $0x1f8] sm:$0xff]  ;;  %1812 = vmatprep.subr.mxu0 %v111_v0  ;;  %v142_v5 = vld [vmem:[%s4203_s1 + $0x1f0] sm:$0xff]  ;;  %v141_v9 = vld [vmem:[%s4203_s1 + $0x1e8] sm:$0xff] }
   0x3   :  { %v95_v2 = vld [vmem:[%s4203_s1 + $0x78] sm:$0xff]  ;;  %1850 = vmatprep.subr.mxu1 %v143_v1  ;;  %v94_v6 = vld [vmem:[%s4203_s1 + $0x70] sm:$0xff]  ;;  %v93_v10 = vld [vmem:[%s4203_s1 + $0x68] sm:$0xff] }
   0x4   :  { %v127_v3 = vld [vmem:[%s4203_s1 + $0x178] sm:$0xff]  ;;  %1813 = vmatpush3.msra.mxu0 %v95_v2  ;;  %v126_v7 = vld [vmem:[%s4203_s1 + $0x170] sm:$0xff]  ;;  %v125_v11 = vld [vmem:[%s4203_s1 + $0x168] sm:$0xff] }
   0x5   :  { %1851 = vmatpush3.msra.mxu1 %v127_v3  ;;  %1814 = vmatprep.subr.mxu0 %v110_v4  ;;  %v108_v12 = vld [vmem:[%s4203_s1 + $0xe0] sm:$0xff]  ;;  %v107_v16 = vld [vmem:[%s4203_s1 + $0xd8] sm:$0xff]  ;;  %v106_v20 = vld [vmem:[%s4203_s1 + $0xd0] sm:$0xff] }
   0x6   :  { %1852 = vmatprep.subr.mxu1 %v142_v5  ;;  %1815 = vmatpush3.msra.mxu0 %v94_v6  ;;  %v140_v13 = vld [vmem:[%s4203_s1 + $0x1e0] sm:$0xff]  ;;  %v139_v17 = vld [vmem:[%s4203_s1 + $0x1d8] sm:$0xff]  ;;  %v138_v21 = vld [vmem:[%s4203_s1 + $0x1d0] sm:$0xff] }
   0x7   :  { %1853 = vmatpush3.msra.mxu1 %v126_v7  ;;  %1816 = vmatprep.subr.mxu0 %v109_v8  ;;  %v92_v14 = vld [vmem:[%s4203_s1 + $0x60] sm:$0xff]  ;;  %v91_v18 = vld [vmem:[%s4203_s1 + $0x58] sm:$0xff]  ;;  %v90_v22 = vld [vmem:[%s4203_s1 + $0x50] sm:$0xff] }
   0x8   :  { %1854 = vmatprep.subr.mxu1 %v141_v9  ;;  %v124_v15 = vld [vmem:[%s4203_s1 + $0x160] sm:$0xff]  ;;  %1817 = vmatpush3.msra.mxu0 %v93_v10  ;;  %v123_v19 = vld [vmem:[%s4203_s1 + $0x158] sm:$0xff]  ;;  %v122_v23 = vld [vmem:[%s4203_s1 + $0x150] sm:$0xff] }
   0x9   :  { %1855 = vmatpush3.msra.mxu1 %v125_v11  ;;  %1818 = vmatprep.subr.mxu0 %v108_v12  ;;  %v105_v24 = vld [vmem:[%s4203_s1 + $0xc8] sm:$0xff]  ;;  %v104_v28 = vld [vmem:[%s4203_s1 + $0xc0] sm:$0xff]  ;;  %v103_v32 = vld [vmem:[%s4203_s1 + $0xb8] sm:$0xff] }
   0xa   :  { %1856 = vmatprep.subr.mxu1 %v140_v13  ;;  %1819 = vmatpush3.msra.mxu0 %v92_v14  ;;  %v137_v25 = vld [vmem:[%s4203_s1 + $0x1c8] sm:$0xff]  ;;  %v136_v29 = vld [vmem:[%s4203_s1 + $0x1c0] sm:$0xff]  ;;  %v135_v33 = vld [vmem:[%s4203_s1 + $0x1b8] sm:$0xff] }
   0xb   :  { %1857 = vmatpush3.msra.mxu1 %v124_v15  ;;  %1820 = vmatprep.subr.mxu0 %v107_v16  ;;  %v89_v26 = vld [vmem:[%s4203_s1 + $0x48] sm:$0xff]  ;;  %v88_v30 = vld [vmem:[%s4203_s1 + $0x40] sm:$0xff]  ;;  %v87_v34 = vld [vmem:[%s4203_s1 + $0x38] sm:$0xff] }
   0xc   :  { %1858 = vmatprep.subr.mxu1 %v139_v17  ;;  %1821 = vmatpush3.msra.mxu0 %v91_v18  ;;  %v121_v27 = vld [vmem:[%s4203_s1 + $0x148] sm:$0xff]  ;;  %v120_v31 = vld [vmem:[%s4203_s1 + $0x140] sm:$0xff]  ;;  %v119_v35 = vld [vmem:[%s4203_s1 + $0x138] sm:$0xff] }
   0xd   :  { %1859 = vmatpush3.msra.mxu1 %v123_v19  ;;  %1822 = vmatprep.subr.mxu0 %v106_v20  ;;  %v102_v36 = vld [vmem:[%s4203_s1 + $0xb0] sm:$0xff]  ;;  %v101_v40 = vld [vmem:[%s4203_s1 + $0xa8] sm:$0xff]  ;;  %v100_v44 = vld [vmem:[%s4203_s1 + $0xa0] sm:$0xff] }
   0xe   :  { %1860 = vmatprep.subr.mxu1 %v138_v21  ;;  %1823 = vmatpush3.msra.mxu0 %v90_v22  ;;  %v134_v37 = vld [vmem:[%s4203_s1 + $0x1b0] sm:$0xff]  ;;  %v133_v41 = vld [vmem:[%s4203_s1 + $0x1a8] sm:$0xff]  ;;  %v132_v45 = vld [vmem:[%s4203_s1 + $0x1a0] sm:$0xff] }
   0xf   :  { %1861 = vmatpush3.msra.mxu1 %v122_v23  ;;  %1824 = vmatprep.subr.mxu0 %v105_v24  ;;  %v86_v38 = vld [vmem:[%s4203_s1 + $0x30] sm:$0xff]  ;;  %v85_v42 = vld [vmem:[%s4203_s1 + $0x28] sm:$0xff]  ;;  %v84_v46 = vld [vmem:[%s4203_s1 + $0x20] sm:$0xff] }
  0x10   :  { %1862 = vmatprep.subr.mxu1 %v137_v25  ;;  %1825 = vmatpush3.msra.mxu0 %v89_v26  ;;  %v118_v39 = vld [vmem:[%s4203_s1 + $0x130] sm:$0xff]  ;;  %v117_v43 = vld [vmem:[%s4203_s1 + $0x128] sm:$0xff]  ;;  %v116_v47 = vld [vmem:[%s4203_s1 + $0x120] sm:$0xff] }
  0x11   :  { %1863 = vmatpush3.msra.mxu1 %v121_v27  ;;  %1826 = vmatprep.subr.mxu0 %v104_v28  ;;  %v99_v48 = vld [vmem:[%s4203_s1 + $0x98] sm:$0xff]  ;;  %v98_v52 = vld [vmem:[%s4203_s1 + $0x90] sm:$0xff]  ;;  %v97_v56 = vld [vmem:[%s4203_s1 + $0x88] sm:$0xff] }
  0x12   :  { %1864 = vmatprep.subr.mxu1 %v136_v29  ;;  %1827 = vmatpush3.msra.mxu0 %v88_v30  ;;  %v131_v49 = vld [vmem:[%s4203_s1 + $0x198] sm:$0xff]  ;;  %v130_v53 = vld [vmem:[%s4203_s1 + $0x190] sm:$0xff]  ;;  %v129_v57 = vld [vmem:[%s4203_s1 + $0x188] sm:$0xff] }
  0x13   :  { %1865 = vmatpush3.msra.mxu1 %v120_v31  ;;  %1828 = vmatprep.subr.mxu0 %v103_v32  ;;  %v83_v50 = vld [vmem:[%s4203_s1 + $0x18] sm:$0xff]  ;;  %v82_v54 = vld [vmem:[%s4203_s1 + $0x10] sm:$0xff]  ;;  %v81_v58 = vld [vmem:[%s4203_s1 + $0x8] sm:$0xff] }
  0x14   :  { %1866 = vmatprep.subr.mxu1 %v135_v33  ;;  %1829 = vmatpush3.msra.mxu0 %v87_v34  ;;  %v115_v51 = vld [vmem:[%s4203_s1 + $0x118] sm:$0xff]  ;;  %v114_v55 = vld [vmem:[%s4203_s1 + $0x110] sm:$0xff]  ;;  %v113_v59 = vld [vmem:[%s4203_s1 + $0x108] sm:$0xff] }
  0x15   :  { %1867 = vmatpush3.msra.mxu1 %v119_v35  ;;  %1830 = vmatprep.subr.mxu0 %v102_v36  ;;  %v96_v60 = vld [vmem:[%s4203_s1 + $0x80] sm:$0xff]  ;;  %v17_v63 = vld [vmem:[%s4202_s0 + $0x8] sm:$0xff]  ;;  %v19_v2 = vld [vmem:[%s4202_s0 + $0x18] sm:$0xff] }
  0x16   :  { %1868 = vmatprep.subr.mxu1 %v134_v37  ;;  %1831 = vmatpush3.msra.mxu0 %v86_v38  ;;  %v128_v61 = vld [vmem:[%s4203_s1 + $0x180] sm:$0xff]  ;;  %v175_v3 = vld [vmem:[%s4203_s1 + $0x2f8] sm:$0xff]  ;;  %v18_v5 = vld [vmem:[%s4202_s0 + $0x10] sm:$0xff] }
  0x17   :  { %1869 = vmatpush3.msra.mxu1 %v118_v39  ;;  %1832 = vmatprep.subr.mxu0 %v101_v40  ;;  %v80_v62 = vld [vmem:[%s4203_s1] sm:$0xff]  ;;  %v207_v4 = vld [vmem:[%s4203_s1 + $0x3f8] sm:$0xff]  ;;  %v174_v8 = vld [vmem:[%s4203_s1 + $0x2f0] sm:$0xff] }
  0x18   :  { %1870 = vmatprep.subr.mxu1 %v133_v41  ;;  %1833 = vmatpush3.msra.mxu0 %v85_v42  ;;  %v112_v0 = vld [vmem:[%s4203_s1 + $0x100] sm:$0xff]  ;;  %v159_v6 = vld [vmem:[%s4203_s1 + $0x278] sm:$0xff]  ;;  %v206_v9 = vld [vmem:[%s4203_s1 + $0x3f0] sm:$0xff] }
  0x19   :  { %1871 = vmatpush3.msra.mxu1 %v117_v43  ;;  %1834 = vmatprep.subr.mxu0 %v100_v44  ;;  %v16_v1 = vld [vmem:[%s4202_s0] sm:$0xff]  ;;  %v191_v7 = vld [vmem:[%s4203_s1 + $0x378] sm:$0xff]  ;;  %v158_v10 = vld [vmem:[%s4203_s1 + $0x270] sm:$0xff] }
  0x1a   :  { %1872 = vmatprep.subr.mxu1 %v132_v45  ;;  %1835 = vmatpush3.msra.mxu0 %v84_v46  ;;  %v190_v11 = vld [vmem:[%s4203_s1 + $0x370] sm:$0xff]  ;;  %v173_v12 = vld [vmem:[%s4203_s1 + $0x2e8] sm:$0xff]  ;;  %v172_v16 = vld [vmem:[%s4203_s1 + $0x2e0] sm:$0xff] }
  0x1b   :  { %1873 = vmatpush3.msra.mxu1 %v116_v47  ;;  %1836 = vmatprep.subr.mxu0 %v99_v48  ;;  %v205_v13 = vld [vmem:[%s4203_s1 + $0x3e8] sm:$0xff]  ;;  %v204_v17 = vld [vmem:[%s4203_s1 + $0x3e0] sm:$0xff]  ;;  %v171_v20 = vld [vmem:[%s4203_s1 + $0x2d8] sm:$0xff] }
  0x1c   :  { %1874 = vmatprep.subr.mxu1 %v131_v49  ;;  %1837 = vmatpush3.msra.mxu0 %v83_v50  ;;  %v157_v14 = vld [vmem:[%s4203_s1 + $0x268] sm:$0xff]  ;;  %v156_v18 = vld [vmem:[%s4203_s1 + $0x260] sm:$0xff]  ;;  %v203_v21 = vld [vmem:[%s4203_s1 + $0x3d8] sm:$0xff] }
  0x1d   :  { %1875 = vmatpush3.msra.mxu1 %v115_v51  ;;  %1838 = vmatprep.subr.mxu0 %v98_v52  ;;  %v189_v15 = vld [vmem:[%s4203_s1 + $0x368] sm:$0xff]  ;;  %v188_v19 = vld [vmem:[%s4203_s1 + $0x360] sm:$0xff]  ;;  %v155_v22 = vld [vmem:[%s4203_s1 + $0x258] sm:$0xff] }
  0x1e   :  { %1876 = vmatprep.subr.mxu1 %v130_v53  ;;  %1839 = vmatpush3.msra.mxu0 %v82_v54  ;;  %v187_v23 = vld [vmem:[%s4203_s1 + $0x358] sm:$0xff]  ;;  %v170_v24 = vld [vmem:[%s4203_s1 + $0x2d0] sm:$0xff]  ;;  %v169_v28 = vld [vmem:[%s4203_s1 + $0x2c8] sm:$0xff] }
  0x1f   :  { %1877 = vmatpush3.msra.mxu1 %v114_v55  ;;  %1840 = vmatprep.subr.mxu0 %v97_v56  ;;  %v202_v25 = vld [vmem:[%s4203_s1 + $0x3d0] sm:$0xff]  ;;  %v201_v29 = vld [vmem:[%s4203_s1 + $0x3c8] sm:$0xff]  ;;  %v168_v32 = vld [vmem:[%s4203_s1 + $0x2c0] sm:$0xff] }
  0x20   :  { %1878 = vmatprep.subr.mxu1 %v129_v57  ;;  %1841 = vmatpush3.msra.mxu0 %v81_v58  ;;  %v154_v26 = vld [vmem:[%s4203_s1 + $0x250] sm:$0xff]  ;;  %v153_v30 = vld [vmem:[%s4203_s1 + $0x248] sm:$0xff]  ;;  %v200_v33 = vld [vmem:[%s4203_s1 + $0x3c0] sm:$0xff] }
  0x21   :  { %1879 = vmatpush3.msra.mxu1 %v113_v59  ;;  %1842 = vmatprep.subr.mxu0 %v96_v60  ;;  %v186_v27 = vld [vmem:[%s4203_s1 + $0x350] sm:$0xff]  ;;  %v185_v31 = vld [vmem:[%s4203_s1 + $0x348] sm:$0xff]  ;;  %v152_v34 = vld [vmem:[%s4203_s1 + $0x240] sm:$0xff] }
  0x22   :  { %1880 = vmatprep.subr.mxu1 %v128_v61  ;;  %1843 = vmatpush3.msra.mxu0 %v80_v62  ;;  %v184_v35 = vld [vmem:[%s4203_s1 + $0x340] sm:$0xff]  ;;  %v167_v36 = vld [vmem:[%s4203_s1 + $0x2b8] sm:$0xff]  ;;  %v166_v40 = vld [vmem:[%s4203_s1 + $0x2b0] sm:$0xff] }
  0x23   :  { %658 = vmatprep.mubr.f32.mxu0 %v17_v63  ;;  %1881 = vmatpush3.msra.mxu1 %v112_v0  ;;  %v199_v37 = vld [vmem:[%s4203_s1 + $0x3b8] sm:$0xff]  ;;  %v198_v41 = vld [vmem:[%s4203_s1 + $0x3b0] sm:$0xff]  ;;  %v165_v44 = vld [vmem:[%s4203_s1 + $0x2a8] sm:$0xff] }
  0x24   :  { %659 = vmatmul.mubr.f32.vlgmr.msra.gmra.mxu0 %v16_v1  ;;  %733 = vmatprep.mubr.f32.mxu1 %v19_v2  ;;  %v151_v38 = vld [vmem:[%s4203_s1 + $0x238] sm:$0xff]  ;;  %v150_v42 = vld [vmem:[%s4203_s1 + $0x230] sm:$0xff]  ;;  %v197_v45 = vld [vmem:[%s4203_s1 + $0x3a8] sm:$0xff] }
  0x25   :  { %1888 = vmatprep.subr.mxu0 %v175_v3  ;;  %1926 = vmatprep.subr.mxu1 %v207_v4  ;;  %v183_v39 = vld [vmem:[%s4203_s1 + $0x338] sm:$0xff]  ;;  %v182_v43 = vld [vmem:[%s4203_s1 + $0x330] sm:$0xff]  ;;  %v149_v46 = vld [vmem:[%s4203_s1 + $0x228] sm:$0xff] }
  0x26   :  { %734 = vmatmul.mubr.f32.vlgmr.msra.gmra.mxu1 %v18_v5  ;;  %1889 = vmatpush3.msra.mxu0 %v159_v6  ;;  %v181_v47 = vld [vmem:[%s4203_s1 + $0x328] sm:$0xff]  ;;  %v164_v48 = vld [vmem:[%s4203_s1 + $0x2a0] sm:$0xff]  ;;  %v163_v52 = vld [vmem:[%s4203_s1 + $0x298] sm:$0xff] }
  0x27   :  { %1927 = vmatpush3.msra.mxu1 %v191_v7  ;;  %1890 = vmatprep.subr.mxu0 %v174_v8  ;;  %v196_v49 = vld [vmem:[%s4203_s1 + $0x3a0] sm:$0xff]  ;;  %v195_v53 = vld [vmem:[%s4203_s1 + $0x398] sm:$0xff]  ;;  %v49_v56 = vld [vmem:[%s4202_s0 + $0x108] sm:$0xff] }
  0x28   :  { %1928 = vmatprep.subr.mxu1 %v206_v9  ;;  %1891 = vmatpush3.msra.mxu0 %v158_v10  ;;  %v148_v50 = vld [vmem:[%s4203_s1 + $0x220] sm:$0xff]  ;;  %v147_v54 = vld [vmem:[%s4203_s1 + $0x218] sm:$0xff]  ;;  %v162_v57 = vld [vmem:[%s4203_s1 + $0x290] sm:$0xff] }
  0x29   :  { %1929 = vmatpush3.msra.mxu1 %v190_v11  ;;  %1892 = vmatprep.subr.mxu0 %v173_v12  ;;  %v180_v51 = vld [vmem:[%s4203_s1 + $0x320] sm:$0xff]  ;;  %v179_v55 = vld [vmem:[%s4203_s1 + $0x318] sm:$0xff]  ;;  %v194_v58 = vld [vmem:[%s4203_s1 + $0x390] sm:$0xff] }
  0x2a   :  { %1930 = vmatprep.subr.mxu1 %v205_v13  ;;  %1893 = vmatpush3.msra.mxu0 %v157_v14  ;;  %v48_v59 = vld [vmem:[%s4202_s0 + $0x100] sm:$0xff]  ;;  %v146_v60 = vld [vmem:[%s4203_s1 + $0x210] sm:$0xff]  ;;  %v51_v62 = vld [vmem:[%s4202_s0 + $0x118] sm:$0xff] }
  0x2b   :  { %1931 = vmatpush3.msra.mxu1 %v189_v15  ;;  %1894 = vmatprep.subr.mxu0 %v172_v16  ;;  %v178_v61 = vld [vmem:[%s4203_s1 + $0x310] sm:$0xff]  ;;  %v161_v63 = vld [vmem:[%s4203_s1 + $0x288] sm:$0xff]  ;;  %v160_v4 = vld [vmem:[%s4203_s1 + $0x280] sm:$0xff] }
  0x2c   :  { %1932 = vmatprep.subr.mxu1 %v204_v17  ;;  %1895 = vmatpush3.msra.mxu0 %v156_v18  ;;  %v193_v0 = vld [vmem:[%s4203_s1 + $0x388] sm:$0xff]  ;;  %v50_v1 = vld [vmem:[%s4202_s0 + $0x110] sm:$0xff]  ;;  %v192_v5 = vld [vmem:[%s4203_s1 + $0x380] sm:$0xff] }
  0x2d   :  { %1933 = vmatpush3.msra.mxu1 %v188_v19  ;;  %1896 = vmatprep.subr.mxu0 %v171_v20  ;;  %v145_v2 = vld [vmem:[%s4203_s1 + $0x208] sm:$0xff]  ;;  %v144_v6 = vld [vmem:[%s4203_s1 + $0x200] sm:$0xff]  ;;  %v23_v10 = vld [vmem:[%s4202_s0 + $0x38] sm:$0xff] }
  0x2e   :  { %1934 = vmatprep.subr.mxu1 %v203_v21  ;;  %1897 = vmatpush3.msra.mxu0 %v155_v22  ;;  %v177_v3 = vld [vmem:[%s4203_s1 + $0x308] sm:$0xff]  ;;  %v176_v8 = vld [vmem:[%s4203_s1 + $0x300] sm:$0xff]  ;;  %v239_v11 = vld [vmem:[%s4203_s1 + $0x4f8] sm:$0xff] }
  0x2f   :  { %1935 = vmatpush3.msra.mxu1 %v187_v23  ;;  %1898 = vmatprep.subr.mxu0 %v170_v24  ;;  %v21_v7 = vld [vmem:[%s4202_s0 + $0x28] sm:$0xff]  ;;  %v20_v9 = vld [vmem:[%s4202_s0 + $0x20] sm:$0xff]  ;;  %v271_v12 = vld [vmem:[%s4203_s1 + $0x5f8] sm:$0xff] }
  0x30   :  { %1936 = vmatprep.subr.mxu1 %v202_v25  ;;  %1899 = vmatpush3.msra.mxu0 %v154_v26  ;;  %v22_v13 = vld [vmem:[%s4202_s0 + $0x30] sm:$0xff]  ;;  %v223_v14 = vld [vmem:[%s4203_s1 + $0x478] sm:$0xff]  ;;  %v53_v18 = vld [vmem:[%s4202_s0 + $0x128] sm:$0xff] }
  0x31   :  { %1937 = vmatpush3.msra.mxu1 %v186_v27  ;;  %1900 = vmatprep.subr.mxu0 %v169_v28  ;;  %v255_v15 = vld [vmem:[%s4203_s1 + $0x578] sm:$0xff]  ;;  %v238_v16 = vld [vmem:[%s4203_s1 + $0x4f0] sm:$0xff]  ;;  %v52_v21 = vld [vmem:[%s4202_s0 + $0x120] sm:$0xff] }
  0x32   :  { %1938 = vmatprep.subr.mxu1 %v201_v29  ;;  %1901 = vmatpush3.msra.mxu0 %v153_v30  ;;  %v270_v17 = vld [vmem:[%s4203_s1 + $0x5f0] sm:$0xff]  ;;  %v237_v22 = vld [vmem:[%s4203_s1 + $0x4e8] sm:$0xff]  ;;  %v55_v24 = vld [vmem:[%s4202_s0 + $0x138] sm:$0xff] }
  0x33   :  { %1939 = vmatpush3.msra.mxu1 %v185_v31  ;;  %1902 = vmatprep.subr.mxu0 %v168_v32  ;;  %v222_v19 = vld [vmem:[%s4203_s1 + $0x470] sm:$0xff]  ;;  %v269_v23 = vld [vmem:[%s4203_s1 + $0x5e8] sm:$0xff]  ;;  %v236_v27 = vld [vmem:[%s4203_s1 + $0x4e0] sm:$0xff] }
  0x34   :  { %1940 = vmatprep.subr.mxu1 %v200_v33  ;;  %1903 = vmatpush3.msra.mxu0 %v152_v34  ;;  %v254_v20 = vld [vmem:[%s4203_s1 + $0x570] sm:$0xff]  ;;  %v221_v25 = vld [vmem:[%s4203_s1 + $0x468] sm:$0xff]  ;;  %v268_v29 = vld [vmem:[%s4203_s1 + $0x5e0] sm:$0xff] }
  0x35   :  { %1941 = vmatpush3.msra.mxu1 %v184_v35  ;;  %1904 = vmatprep.subr.mxu0 %v167_v36  ;;  %v253_v26 = vld [vmem:[%s4203_s1 + $0x568] sm:$0xff]  ;;  %v54_v28 = vld [vmem:[%s4202_s0 + $0x130] sm:$0xff]  ;;  %v220_v30 = vld [vmem:[%s4203_s1 + $0x460] sm:$0xff] }
  0x36   :  { %1942 = vmatprep.subr.mxu1 %v199_v37  ;;  %1905 = vmatpush3.msra.mxu0 %v151_v38  ;;  %v252_v31 = vld [vmem:[%s4203_s1 + $0x560] sm:$0xff]  ;;  %v235_v32 = vld [vmem:[%s4203_s1 + $0x4d8] sm:$0xff]  ;;  %v234_v36 = vld [vmem:[%s4203_s1 + $0x4d0] sm:$0xff] }
  0x37   :  { %1943 = vmatpush3.msra.mxu1 %v183_v39  ;;  %1906 = vmatprep.subr.mxu0 %v166_v40  ;;  %v267_v33 = vld [vmem:[%s4203_s1 + $0x5d8] sm:$0xff]  ;;  %v266_v37 = vld [vmem:[%s4203_s1 + $0x5d0] sm:$0xff]  ;;  %v233_v40 = vld [vmem:[%s4203_s1 + $0x4c8] sm:$0xff] }
  0x38   :  { %1944 = vmatprep.subr.mxu1 %v198_v41  ;;  %1907 = vmatpush3.msra.mxu0 %v150_v42  ;;  %v219_v34 = vld [vmem:[%s4203_s1 + $0x458] sm:$0xff]  ;;  %v218_v38 = vld [vmem:[%s4203_s1 + $0x450] sm:$0xff]  ;;  %v265_v41 = vld [vmem:[%s4203_s1 + $0x5c8] sm:$0xff] }
  0x39   :  { %1945 = vmatpush3.msra.mxu1 %v182_v43  ;;  %1908 = vmatprep.subr.mxu0 %v165_v44  ;;  %v251_v35 = vld [vmem:[%s4203_s1 + $0x558] sm:$0xff]  ;;  %v250_v39 = vld [vmem:[%s4203_s1 + $0x550] sm:$0xff]  ;;  %v217_v42 = vld [vmem:[%s4203_s1 + $0x448] sm:$0xff] }
  0x3a   :  { %1946 = vmatprep.subr.mxu1 %v197_v45  ;;  %1909 = vmatpush3.msra.mxu0 %v149_v46  ;;  %v249_v43 = vld [vmem:[%s4203_s1 + $0x548] sm:$0xff]  ;;  %v232_v44 = vld [vmem:[%s4203_s1 + $0x4c0] sm:$0xff] }
  0x3b   :  { %1947 = vmatpush3.msra.mxu1 %v181_v47  ;;  %1910 = vmatprep.subr.mxu0 %v164_v48  ;;  %v264_v45 = vld [vmem:[%s4203_s1 + $0x5c0] sm:$0xff]  ;;  %v231_v48 = vld [vmem:[%s4203_s1 + $0x4b8] sm:$0xff] }
  0x3c   :  { %1948 = vmatprep.subr.mxu1 %v196_v49  ;;  %1911 = vmatpush3.msra.mxu0 %v148_v50  ;;  %v216_v46 = vld [vmem:[%s4203_s1 + $0x440] sm:$0xff]  ;;  %v263_v49 = vld [vmem:[%s4203_s1 + $0x5b8] sm:$0xff] }
  0x3d   :  { %1949 = vmatpush3.msra.mxu1 %v180_v51  ;;  %1912 = vmatprep.subr.mxu0 %v163_v52  ;;  %v248_v47 = vld [vmem:[%s4203_s1 + $0x540] sm:$0xff]  ;;  %v215_v50 = vld [vmem:[%s4203_s1 + $0x438] sm:$0xff]  ;;  %v230_v52 = vld [vmem:[%s4203_s1 + $0x4b0] sm:$0xff] }
  0x3e   :  { %1950 = vmatprep.subr.mxu1 %v195_v53  ;;  %1913 = vmatpush3.msra.mxu0 %v147_v54  ;;  %v247_v51 = vld [vmem:[%s4203_s1 + $0x538] sm:$0xff]  ;;  %v262_v53 = vld [vmem:[%s4203_s1 + $0x5b0] sm:$0xff] }
  0x3f   :  { %1951 = vmatpush3.msra.mxu1 %v179_v55  ;;  %663 = vmatprep.mubr.f32.mxu0 %v49_v56  ;;  %v214_v54 = vld [vmem:[%s4203_s1 + $0x430] sm:$0xff]  ;;  %v229_v56 = vld [vmem:[%s4203_s1 + $0x4a8] sm:$0xff] }
  0x40   :  { %1914 = vmatprep.subr.mxu0 %v162_v57  ;;  %1952 = vmatprep.subr.mxu1 %v194_v58  ;;  %v246_v55 = vld [vmem:[%s4203_s1 + $0x530] sm:$0xff]  ;;  %v261_v57 = vld [vmem:[%s4203_s1 + $0x5a8] sm:$0xff] }
  0x41   :  { %664 = vmatmul.mubr.f32.gmra.mxu0 %v48_v59  ;;  %1953 = vmatpush3.msra.mxu1 %v178_v61  ;;  %v213_v58 = vld [vmem:[%s4203_s1 + $0x428] sm:$0xff]  ;;  %v260_v61 = vld [vmem:[%s4203_s1 + $0x5a0] sm:$0xff] }
  0x42   :  { %1915 = vmatpush3.msra.mxu0 %v146_v60  ;;  %738 = vmatprep.mubr.f32.mxu1 %v51_v62  ;;  %v245_v59 = vld [vmem:[%s4203_s1 + $0x528] sm:$0xff]  ;;  %v228_v60 = vld [vmem:[%s4203_s1 + $0x4a0] sm:$0xff] }
  0x43   :  { %1916 = vmatprep.subr.mxu0 %v161_v63  ;;  %1954 = vmatprep.subr.mxu1 %v193_v0  ;;  %v212_v62 = vld [vmem:[%s4203_s1 + $0x420] sm:$0xff]  ;;  %v227_v0 = vld [vmem:[%s4203_s1 + $0x498] sm:$0xff] }
  0x44   :  { %739 = vmatmul.mubr.f32.gmra.mxu1 %v50_v1  ;;  %1917 = vmatpush3.msra.mxu0 %v145_v2  ;;  %v244_v63 = vld [vmem:[%s4203_s1 + $0x520] sm:$0xff]  ;;  %v259_v1 = vld [vmem:[%s4203_s1 + $0x598] sm:$0xff] }
  0x45   :  { %1955 = vmatpush3.msra.mxu1 %v177_v3  ;;  %1918 = vmatprep.subr.mxu0 %v160_v4  ;;  %v211_v2 = vld [vmem:[%s4203_s1 + $0x418] sm:$0xff]  ;;  %v226_v4 = vld [vmem:[%s4203_s1 + $0x490] sm:$0xff] }
  0x46   :  { %1956 = vmatprep.subr.mxu1 %v192_v5  ;;  %1919 = vmatpush3.msra.mxu0 %v144_v6  ;;  %v243_v3 = vld [vmem:[%s4203_s1 + $0x518] sm:$0xff]  ;;  %v258_v5 = vld [vmem:[%s4203_s1 + $0x590] sm:$0xff] }
  0x47   :  { %808 = vmatprep.mubr.f32.mxu0 %v21_v7  ;;  %1957 = vmatpush3.msra.mxu1 %v176_v8  ;;  %v210_v6 = vld [vmem:[%s4203_s1 + $0x410] sm:$0xff]  ;;  %v225_v8 = vld [vmem:[%s4203_s1 + $0x488] sm:$0xff] }
  0x48   :  { %809 = vmatmul.mubr.f32.vlgmr.msra.gmra.mxu0 %v20_v9  ;;  %883 = vmatprep.mubr.f32.mxu1 %v23_v10  ;;  %v242_v7 = vld [vmem:[%s4203_s1 + $0x510] sm:$0xff]  ;;  %v257_v9 = vld [vmem:[%s4203_s1 + $0x588] sm:$0xff] }
  0x49   :  { %1964 = vmatprep.subr.mxu0 %v239_v11  ;;  %2002 = vmatprep.subr.mxu1 %v271_v12  ;;  %v209_v10 = vld [vmem:[%s4203_s1 + $0x408] sm:$0xff]  ;;  %v224_v12 = vld [vmem:[%s4203_s1 + $0x480] sm:$0xff] }
  0x4a   :  { %884 = vmatmul.mubr.f32.vlgmr.msra.gmra.mxu1 %v22_v13  ;;  %1965 = vmatpush3.msra.mxu0 %v223_v14  ;;  %v241_v11 = vld [vmem:[%s4203_s1 + $0x508] sm:$0xff]  ;;  %v256_v13 = vld [vmem:[%s4203_s1 + $0x580] sm:$0xff] }
  0x4b   :  { %2003 = vmatpush3.msra.mxu1 %v255_v15  ;;  %1966 = vmatprep.subr.mxu0 %v238_v16  ;;  %v208_v14 = vld [vmem:[%s4203_s1 + $0x400] sm:$0xff]  ;;  %v25_v15 = vld [vmem:[%s4202_s0 + $0x48] sm:$0xff] }
  0x4c   :  { %2004 = vmatprep.subr.mxu1 %v270_v17  ;;  %813 = vmatprep.mubr.f32.mxu0 %v53_v18  ;;  %v240_v16 = vld [vmem:[%s4203_s1 + $0x500] sm:$0xff]  ;;  %v27_v18 = vld [vmem:[%s4202_s0 + $0x58] sm:$0xff] }
  0x4d   :  { %1967 = vmatpush3.msra.mxu0 %v222_v19  ;;  %2005 = vmatpush3.msra.mxu1 %v254_v20  ;;  %v24_v17 = vld [vmem:[%s4202_s0 + $0x40] sm:$0xff]  ;;  %v303_v19 = vld [vmem:[%s4203_s1 + $0x6f8] sm:$0xff] }
  0x4e   :  { %814 = vmatmul.mubr.f32.gmra.mxu0 %v52_v21  ;;  %1968 = vmatprep.subr.mxu0 %v237_v22  ;;  %v335_v20 = vld [vmem:[%s4203_s1 + $0x7f8] sm:$0xff]  ;;  %v26_v21 = vld [vmem:[%s4202_s0 + $0x50] sm:$0xff] }
  0x4f   :  { %2006 = vmatprep.subr.mxu1 %v269_v23  ;;  %888 = vmatprep.mubr.f32.mxu1 %v55_v24  ;;  %v287_v22 = vld [vmem:[%s4203_s1 + $0x678] sm:$0xff]  ;;  %v302_v24 = vld [vmem:[%s4203_s1 + $0x6f0] sm:$0xff] }
  0x50   :  { %1969 = vmatpush3.msra.mxu0 %v221_v25  ;;  %2007 = vmatpush3.msra.mxu1 %v253_v26  ;;  %v319_v23 = vld [vmem:[%s4203_s1 + $0x778] sm:$0xff]  ;;  %v334_v25 = vld [vmem:[%s4203_s1 + $0x7f0] sm:$0xff]  ;;  %v57_v26 = vld [vmem:[%s4202_s0 + $0x148] sm:$0xff] }
  0x51   :  { %1970 = vmatprep.subr.mxu0 %v236_v27  ;;  %889 = vmatmul.mubr.f32.gmra.mxu1 %v54_v28  ;;  %v286_v27 = vld [vmem:[%s4203_s1 + $0x670] sm:$0xff] }
  0x52   :  { %2008 = vmatprep.subr.mxu1 %v268_v29  ;;  %1971 = vmatpush3.msra.mxu0 %v220_v30  ;;  %v318_v28 = vld [vmem:[%s4203_s1 + $0x770] sm:$0xff]  ;;  %v56_v29 = vld [vmem:[%s4202_s0 + $0x140] sm:$0xff]  ;;  %v301_v30 = vld [vmem:[%s4203_s1 + $0x6e8] sm:$0xff] }
  0x53   :  { %2009 = vmatpush3.msra.mxu1 %v252_v31  ;;  %1972 = vmatprep.subr.mxu0 %v235_v32  ;;  %v333_v31 = vld [vmem:[%s4203_s1 + $0x7e8] sm:$0xff]  ;;  %v59_v32 = vld [vmem:[%s4202_s0 + $0x158] sm:$0xff] }
  0x54   :  { %2010 = vmatprep.subr.mxu1 %v267_v33  ;;  %1973 = vmatpush3.msra.mxu0 %v219_v34  ;;  %v285_v33 = vld [vmem:[%s4203_s1 + $0x668] sm:$0xff] }
  0x55   :  { %2011 = vmatpush3.msra.mxu1 %v251_v35  ;;  %1974 = vmatprep.subr.mxu0 %v234_v36  ;;  %v317_v34 = vld [vmem:[%s4203_s1 + $0x768] sm:$0xff]  ;;  %v300_v35 = vld [vmem:[%s4203_s1 + $0x6e0] sm:$0xff]  ;;  %v58_v36 = vld [vmem:[%s4202_s0 + $0x150] sm:$0xff] }
  0x56   :  { %2012 = vmatprep.subr.mxu1 %v266_v37  ;;  %1975 = vmatpush3.msra.mxu0 %v218_v38  ;;  %v332_v37 = vld [vmem:[%s4203_s1 + $0x7e0] sm:$0xff] }
  0x57   :  { %2013 = vmatpush3.msra.mxu1 %v250_v39  ;;  %1976 = vmatprep.subr.mxu0 %v233_v40  ;;  %v284_v38 = vld [vmem:[%s4203_s1 + $0x660] sm:$0xff]  ;;  %v299_v40 = vld [vmem:[%s4203_s1 + $0x6d8] sm:$0xff] }
  0x58   :  { %2014 = vmatprep.subr.mxu1 %v265_v41  ;;  %1977 = vmatpush3.msra.mxu0 %v217_v42  ;;  %v316_v39 = vld [vmem:[%s4203_s1 + $0x760] sm:$0xff]  ;;  %v331_v41 = vld [vmem:[%s4203_s1 + $0x7d8] sm:$0xff] }
  0x59   :  { %2015 = vmatpush3.msra.mxu1 %v249_v43  ;;  %1978 = vmatprep.subr.mxu0 %v232_v44  ;;  %v283_v42 = vld [vmem:[%s4203_s1 + $0x658] sm:$0xff]  ;;  %v298_v44 = vld [vmem:[%s4203_s1 + $0x6d0] sm:$0xff] }
  0x5a   :  { %2016 = vmatprep.subr.mxu1 %v264_v45  ;;  %1979 = vmatpush3.msra.mxu0 %v216_v46  ;;  %v315_v43 = vld [vmem:[%s4203_s1 + $0x758] sm:$0xff]  ;;  %v330_v45 = vld [vmem:[%s4203_s1 + $0x7d0] sm:$0xff] }
  0x5b   :  { %2017 = vmatpush3.msra.mxu1 %v248_v47  ;;  %1980 = vmatprep.subr.mxu0 %v231_v48  ;;  %v282_v46 = vld [vmem:[%s4203_s1 + $0x650] sm:$0xff]  ;;  %v297_v48 = vld [vmem:[%s4203_s1 + $0x6c8] sm:$0xff] }
  0x5c   :  { %2018 = vmatprep.subr.mxu1 %v263_v49  ;;  %1981 = vmatpush3.msra.mxu0 %v215_v50  ;;  %v314_v47 = vld [vmem:[%s4203_s1 + $0x750] sm:$0xff]  ;;  %v329_v49 = vld [vmem:[%s4203_s1 + $0x7c8] sm:$0xff] }
  0x5d   :  { %2019 = vmatpush3.msra.mxu1 %v247_v51  ;;  %1982 = vmatprep.subr.mxu0 %v230_v52  ;;  %v281_v50 = vld [vmem:[%s4203_s1 + $0x648] sm:$0xff]  ;;  %v296_v52 = vld [vmem:[%s4203_s1 + $0x6c0] sm:$0xff] }
  0x5e   :  { %2020 = vmatprep.subr.mxu1 %v262_v53  ;;  %1983 = vmatpush3.msra.mxu0 %v214_v54  ;;  %v313_v51 = vld [vmem:[%s4203_s1 + $0x748] sm:$0xff]  ;;  %v328_v53 = vld [vmem:[%s4203_s1 + $0x7c0] sm:$0xff] }
  0x5f   :  { %2021 = vmatpush3.msra.mxu1 %v246_v55  ;;  %1984 = vmatprep.subr.mxu0 %v229_v56  ;;  %v280_v54 = vld [vmem:[%s4203_s1 + $0x640] sm:$0xff]  ;;  %v295_v56 = vld [vmem:[%s4203_s1 + $0x6b8] sm:$0xff] }
  0x60   :  { %2022 = vmatprep.subr.mxu1 %v261_v57  ;;  %1985 = vmatpush3.msra.mxu0 %v213_v58  ;;  %v312_v55 = vld [vmem:[%s4203_s1 + $0x740] sm:$0xff]  ;;  %v327_v57 = vld [vmem:[%s4203_s1 + $0x7b8] sm:$0xff] }
  0x61   :  { %2023 = vmatpush3.msra.mxu1 %v245_v59  ;;  %1986 = vmatprep.subr.mxu0 %v228_v60  ;;  %v279_v58 = vld [vmem:[%s4203_s1 + $0x638] sm:$0xff]  ;;  %v294_v60 = vld [vmem:[%s4203_s1 + $0x6b0] sm:$0xff] }
  0x62   :  { %2024 = vmatprep.subr.mxu1 %v260_v61  ;;  %1987 = vmatpush3.msra.mxu0 %v212_v62  ;;  %v311_v59 = vld [vmem:[%s4203_s1 + $0x738] sm:$0xff]  ;;  %v326_v61 = vld [vmem:[%s4203_s1 + $0x7b0] sm:$0xff] }
  0x63   :  { %2025 = vmatpush3.msra.mxu1 %v244_v63  ;;  %1988 = vmatprep.subr.mxu0 %v227_v0  ;;  %v278_v62 = vld [vmem:[%s4203_s1 + $0x630] sm:$0xff]  ;;  %v293_v0 = vld [vmem:[%s4203_s1 + $0x6a8] sm:$0xff] }
  0x64   :  { %2026 = vmatprep.subr.mxu1 %v259_v1  ;;  %1989 = vmatpush3.msra.mxu0 %v211_v2  ;;  %v310_v63 = vld [vmem:[%s4203_s1 + $0x730] sm:$0xff]  ;;  %v325_v1 = vld [vmem:[%s4203_s1 + $0x7a8] sm:$0xff] }
  0x65   :  { %2027 = vmatpush3.msra.mxu1 %v243_v3  ;;  %1990 = vmatprep.subr.mxu0 %v226_v4  ;;  %v277_v2 = vld [vmem:[%s4203_s1 + $0x628] sm:$0xff]  ;;  %v292_v4 = vld [vmem:[%s4203_s1 + $0x6a0] sm:$0xff] }
  0x66   :  { %2028 = vmatprep.subr.mxu1 %v258_v5  ;;  %1991 = vmatpush3.msra.mxu0 %v210_v6  ;;  %v309_v3 = vld [vmem:[%s4203_s1 + $0x728] sm:$0xff]  ;;  %v324_v5 = vld [vmem:[%s4203_s1 + $0x7a0] sm:$0xff] }
  0x67   :  { %2029 = vmatpush3.msra.mxu1 %v242_v7  ;;  %1992 = vmatprep.subr.mxu0 %v225_v8  ;;  %v276_v6 = vld [vmem:[%s4203_s1 + $0x620] sm:$0xff]  ;;  %v291_v8 = vld [vmem:[%s4203_s1 + $0x698] sm:$0xff] }
  0x68   :  { %2030 = vmatprep.subr.mxu1 %v257_v9  ;;  %1993 = vmatpush3.msra.mxu0 %v209_v10  ;;  %v308_v7 = vld [vmem:[%s4203_s1 + $0x720] sm:$0xff]  ;;  %v323_v9 = vld [vmem:[%s4203_s1 + $0x798] sm:$0xff] }
  0x69   :  { %2031 = vmatpush3.msra.mxu1 %v241_v11  ;;  %1994 = vmatprep.subr.mxu0 %v224_v12  ;;  %v275_v10 = vld [vmem:[%s4203_s1 + $0x618] sm:$0xff]  ;;  %v290_v12 = vld [vmem:[%s4203_s1 + $0x690] sm:$0xff] }
  0x6a   :  { %2032 = vmatprep.subr.mxu1 %v256_v13  ;;  %1995 = vmatpush3.msra.mxu0 %v208_v14  ;;  %v307_v11 = vld [vmem:[%s4203_s1 + $0x718] sm:$0xff]  ;;  %v322_v13 = vld [vmem:[%s4203_s1 + $0x790] sm:$0xff] }
  0x6b   :  { %958 = vmatprep.mubr.f32.mxu0 %v25_v15  ;;  %2033 = vmatpush3.msra.mxu1 %v240_v16  ;;  %v274_v14 = vld [vmem:[%s4203_s1 + $0x610] sm:$0xff]  ;;  %v289_v16 = vld [vmem:[%s4203_s1 + $0x688] sm:$0xff] }
  0x6c   :  { %959 = vmatmul.mubr.f32.vlgmr.msra.gmra.mxu0 %v24_v17  ;;  %1033 = vmatprep.mubr.f32.mxu1 %v27_v18  ;;  %v306_v15 = vld [vmem:[%s4203_s1 + $0x710] sm:$0xff]  ;;  %v321_v17 = vld [vmem:[%s4203_s1 + $0x788] sm:$0xff] }
  0x6d   :  { %2040 = vmatprep.subr.mxu0 %v303_v19  ;;  %2078 = vmatprep.subr.mxu1 %v335_v20  ;;  %v273_v18 = vld [vmem:[%s4203_s1 + $0x608] sm:$0xff]  ;;  %v288_v20 = vld [vmem:[%s4203_s1 + $0x680] sm:$0xff] }
  0x6e   :  { %1034 = vmatmul.mubr.f32.vlgmr.msra.gmra.mxu1 %v26_v21  ;;  %2041 = vmatpush3.msra.mxu0 %v287_v22  ;;  %v305_v19 = vld [vmem:[%s4203_s1 + $0x708] sm:$0xff]  ;;  %v320_v21 = vld [vmem:[%s4203_s1 + $0x780] sm:$0xff] }
  0x6f   :  { %2079 = vmatpush3.msra.mxu1 %v319_v23  ;;  %2042 = vmatprep.subr.mxu0 %v302_v24  ;;  %v272_v22 = vld [vmem:[%s4203_s1 + $0x600] sm:$0xff]  ;;  %v29_v23 = vld [vmem:[%s4202_s0 + $0x68] sm:$0xff] }
  0x70   :  { %2080 = vmatprep.subr.mxu1 %v334_v25  ;;  %963 = vmatprep.mubr.f32.mxu0 %v57_v26  ;;  %v304_v24 = vld [vmem:[%s4203_s1 + $0x700] sm:$0xff]  ;;  %v31_v26 = vld [vmem:[%s4202_s0 + $0x78] sm:$0xff] }
  0x71   :  { %2043 = vmatpush3.msra.mxu0 %v286_v27  ;;  %2081 = vmatpush3.msra.mxu1 %v318_v28  ;;  %v28_v25 = vld [vmem:[%s4202_s0 + $0x60] sm:$0xff]  ;;  %v367_v27 = vld [vmem:[%s4203_s1 + $0x8f8] sm:$0xff] }
  0x72   :  { %964 = vmatmul.mubr.f32.gmra.mxu0 %v56_v29  ;;  %2044 = vmatprep.subr.mxu0 %v301_v30  ;;  %v399_v28 = vld [vmem:[%s4203_s1 + $0x9f8] sm:$0xff]  ;;  %v30_v29 = vld [vmem:[%s4202_s0 + $0x70] sm:$0xff] }
  0x73   :  { %2082 = vmatprep.subr.mxu1 %v333_v31  ;;  %1038 = vmatprep.mubr.f32.mxu1 %v59_v32  ;;  %v351_v30 = vld [vmem:[%s4203_s1 + $0x878] sm:$0xff]  ;;  %v366_v32 = vld [vmem:[%s4203_s1 + $0x8f0] sm:$0xff] }
  0x74   :  { %2045 = vmatpush3.msra.mxu0 %v285_v33  ;;  %2083 = vmatpush3.msra.mxu1 %v317_v34  ;;  %v383_v31 = vld [vmem:[%s4203_s1 + $0x978] sm:$0xff]  ;;  %v398_v33 = vld [vmem:[%s4203_s1 + $0x9f0] sm:$0xff]  ;;  %v61_v34 = vld [vmem:[%s4202_s0 + $0x168] sm:$0xff] }
  0x75   :  { %2046 = vmatprep.subr.mxu0 %v300_v35  ;;  %1039 = vmatmul.mubr.f32.gmra.mxu1 %v58_v36  ;;  %v350_v35 = vld [vmem:[%s4203_s1 + $0x870] sm:$0xff] }
  0x76   :  { %2084 = vmatprep.subr.mxu1 %v332_v37  ;;  %2047 = vmatpush3.msra.mxu0 %v284_v38  ;;  %v382_v36 = vld [vmem:[%s4203_s1 + $0x970] sm:$0xff]  ;;  %v60_v37 = vld [vmem:[%s4202_s0 + $0x160] sm:$0xff]  ;;  %v365_v38 = vld [vmem:[%s4203_s1 + $0x8e8] sm:$0xff] }
  0x77   :  { %2085 = vmatpush3.msra.mxu1 %v316_v39  ;;  %2048 = vmatprep.subr.mxu0 %v299_v40  ;;  %v397_v39 = vld [vmem:[%s4203_s1 + $0x9e8] sm:$0xff]  ;;  %v63_v40 = vld [vmem:[%s4202_s0 + $0x178] sm:$0xff] }
  0x78   :  { %2086 = vmatprep.subr.mxu1 %v331_v41  ;;  %2049 = vmatpush3.msra.mxu0 %v283_v42  ;;  %v349_v41 = vld [vmem:[%s4203_s1 + $0x868] sm:$0xff] }
  0x79   :  { %2087 = vmatpush3.msra.mxu1 %v315_v43  ;;  %2050 = vmatprep.subr.mxu0 %v298_v44  ;;  %v381_v42 = vld [vmem:[%s4203_s1 + $0x968] sm:$0xff]  ;;  %v364_v43 = vld [vmem:[%s4203_s1 + $0x8e0] sm:$0xff]  ;;  %v62_v44 = vld [vmem:[%s4202_s0 + $0x170] sm:$0xff] }
  0x7a   :  { %2088 = vmatprep.subr.mxu1 %v330_v45  ;;  %2051 = vmatpush3.msra.mxu0 %v282_v46  ;;  %v396_v45 = vld [vmem:[%s4203_s1 + $0x9e0] sm:$0xff] }
  0x7b   :  { %2089 = vmatpush3.msra.mxu1 %v314_v47  ;;  %2052 = vmatprep.subr.mxu0 %v297_v48  ;;  %v348_v46 = vld [vmem:[%s4203_s1 + $0x860] sm:$0xff]  ;;  %v363_v48 = vld [vmem:[%s4203_s1 + $0x8d8] sm:$0xff] }
  0x7c   :  { %2090 = vmatprep.subr.mxu1 %v329_v49  ;;  %2053 = vmatpush3.msra.mxu0 %v281_v50  ;;  %v380_v47 = vld [vmem:[%s4203_s1 + $0x960] sm:$0xff]  ;;  %v395_v49 = vld [vmem:[%s4203_s1 + $0x9d8] sm:$0xff] }
  0x7d   :  { %2091 = vmatpush3.msra.mxu1 %v313_v51  ;;  %2054 = vmatprep.subr.mxu0 %v296_v52  ;;  %v347_v50 = vld [vmem:[%s4203_s1 + $0x858] sm:$0xff]  ;;  %v362_v52 = vld [vmem:[%s4203_s1 + $0x8d0] sm:$0xff] }
  0x7e   :  { %2092 = vmatprep.subr.mxu1 %v328_v53  ;;  %2055 = vmatpush3.msra.mxu0 %v280_v54  ;;  %v379_v51 = vld [vmem:[%s4203_s1 + $0x958] sm:$0xff]  ;;  %v394_v53 = vld [vmem:[%s4203_s1 + $0x9d0] sm:$0xff] }
  0x7f   :  { %2093 = vmatpush3.msra.mxu1 %v312_v55  ;;  %2056 = vmatprep.subr.mxu0 %v295_v56  ;;  %v346_v54 = vld [vmem:[%s4203_s1 + $0x850] sm:$0xff]  ;;  %v361_v56 = vld [vmem:[%s4203_s1 + $0x8c8] sm:$0xff] }
  0x80   :  { %2094 = vmatprep.subr.mxu1 %v327_v57  ;;  %2057 = vmatpush3.msra.mxu0 %v279_v58  ;;  %v378_v55 = vld [vmem:[%s4203_s1 + $0x950] sm:$0xff]  ;;  %v393_v57 = vld [vmem:[%s4203_s1 + $0x9c8] sm:$0xff] }
  0x81   :  { %2095 = vmatpush3.msra.mxu1 %v311_v59  ;;  %2058 = vmatprep.subr.mxu0 %v294_v60  ;;  %v345_v58 = vld [vmem:[%s4203_s1 + $0x848] sm:$0xff]  ;;  %v360_v60 = vld [vmem:[%s4203_s1 + $0x8c0] sm:$0xff] }
  0x82   :  { %2096 = vmatprep.subr.mxu1 %v326_v61  ;;  %2059 = vmatpush3.msra.mxu0 %v278_v62  ;;  %v377_v59 = vld [vmem:[%s4203_s1 + $0x948] sm:$0xff]  ;;  %v392_v61 = vld [vmem:[%s4203_s1 + $0x9c0] sm:$0xff] }
  0x83   :  { %2097 = vmatpush3.msra.mxu1 %v310_v63  ;;  %2060 = vmatprep.subr.mxu0 %v293_v0  ;;  %v344_v62 = vld [vmem:[%s4203_s1 + $0x840] sm:$0xff]  ;;  %v359_v0 = vld [vmem:[%s4203_s1 + $0x8b8] sm:$0xff] }
  0x84   :  { %2098 = vmatprep.subr.mxu1 %v325_v1  ;;  %2061 = vmatpush3.msra.mxu0 %v277_v2  ;;  %v376_v63 = vld [vmem:[%s4203_s1 + $0x940] sm:$0xff]  ;;  %v391_v1 = vld [vmem:[%s4203_s1 + $0x9b8] sm:$0xff] }
  0x85   :  { %2099 = vmatpush3.msra.mxu1 %v309_v3  ;;  %2062 = vmatprep.subr.mxu0 %v292_v4  ;;  %v343_v2 = vld [vmem:[%s4203_s1 + $0x838] sm:$0xff]  ;;  %v358_v4 = vld [vmem:[%s4203_s1 + $0x8b0] sm:$0xff] }
  0x86   :  { %2100 = vmatprep.subr.mxu1 %v324_v5  ;;  %2063 = vmatpush3.msra.mxu0 %v276_v6  ;;  %v375_v3 = vld [vmem:[%s4203_s1 + $0x938] sm:$0xff]  ;;  %v390_v5 = vld [vmem:[%s4203_s1 + $0x9b0] sm:$0xff] }
  0x87   :  { %2101 = vmatpush3.msra.mxu1 %v308_v7  ;;  %2064 = vmatprep.subr.mxu0 %v291_v8  ;;  %v342_v6 = vld [vmem:[%s4203_s1 + $0x830] sm:$0xff]  ;;  %v357_v8 = vld [vmem:[%s4203_s1 + $0x8a8] sm:$0xff] }
  0x88   :  { %2102 = vmatprep.subr.mxu1 %v323_v9  ;;  %2065 = vmatpush3.msra.mxu0 %v275_v10  ;;  %v374_v7 = vld [vmem:[%s4203_s1 + $0x930] sm:$0xff]  ;;  %v389_v9 = vld [vmem:[%s4203_s1 + $0x9a8] sm:$0xff] }
  0x89   :  { %2103 = vmatpush3.msra.mxu1 %v307_v11  ;;  %2066 = vmatprep.subr.mxu0 %v290_v12  ;;  %v341_v10 = vld [vmem:[%s4203_s1 + $0x828] sm:$0xff]  ;;  %v356_v12 = vld [vmem:[%s4203_s1 + $0x8a0] sm:$0xff] }
  0x8a   :  { %2104 = vmatprep.subr.mxu1 %v322_v13  ;;  %2067 = vmatpush3.msra.mxu0 %v274_v14  ;;  %v373_v11 = vld [vmem:[%s4203_s1 + $0x928] sm:$0xff]  ;;  %v388_v13 = vld [vmem:[%s4203_s1 + $0x9a0] sm:$0xff] }
  0x8b   :  { %2105 = vmatpush3.msra.mxu1 %v306_v15  ;;  %2068 = vmatprep.subr.mxu0 %v289_v16  ;;  %v340_v14 = vld [vmem:[%s4203_s1 + $0x820] sm:$0xff]  ;;  %v355_v16 = vld [vmem:[%s4203_s1 + $0x898] sm:$0xff] }
  0x8c   :  { %2106 = vmatprep.subr.mxu1 %v321_v17  ;;  %2069 = vmatpush3.msra.mxu0 %v273_v18  ;;  %v372_v15 = vld [vmem:[%s4203_s1 + $0x920] sm:$0xff]  ;;  %v387_v17 = vld [vmem:[%s4203_s1 + $0x998] sm:$0xff] }
  0x8d   :  { %2107 = vmatpush3.msra.mxu1 %v305_v19  ;;  %2070 = vmatprep.subr.mxu0 %v288_v20  ;;  %v339_v18 = vld [vmem:[%s4203_s1 + $0x818] sm:$0xff]  ;;  %v354_v20 = vld [vmem:[%s4203_s1 + $0x890] sm:$0xff] }
  0x8e   :  { %2108 = vmatprep.subr.mxu1 %v320_v21  ;;  %2071 = vmatpush3.msra.mxu0 %v272_v22  ;;  %v371_v19 = vld [vmem:[%s4203_s1 + $0x918] sm:$0xff]  ;;  %v386_v21 = vld [vmem:[%s4203_s1 + $0x990] sm:$0xff] }
  0x8f   :  { %1108 = vmatprep.mubr.f32.mxu0 %v29_v23  ;;  %2109 = vmatpush3.msra.mxu1 %v304_v24  ;;  %v338_v22 = vld [vmem:[%s4203_s1 + $0x810] sm:$0xff]  ;;  %v353_v24 = vld [vmem:[%s4203_s1 + $0x888] sm:$0xff] }
  0x90   :  { %1109 = vmatmul.mubr.f32.vlgmr.msra.gmra.mxu0 %v28_v25  ;;  %1183 = vmatprep.mubr.f32.mxu1 %v31_v26  ;;  %v370_v23 = vld [vmem:[%s4203_s1 + $0x910] sm:$0xff]  ;;  %v385_v25 = vld [vmem:[%s4203_s1 + $0x988] sm:$0xff] }
  0x91   :  { %2116 = vmatprep.subr.mxu0 %v367_v27  ;;  %2154 = vmatprep.subr.mxu1 %v399_v28  ;;  %v337_v26 = vld [vmem:[%s4203_s1 + $0x808] sm:$0xff]  ;;  %v352_v28 = vld [vmem:[%s4203_s1 + $0x880] sm:$0xff] }
  0x92   :  { %1184 = vmatmul.mubr.f32.vlgmr.msra.gmra.mxu1 %v30_v29  ;;  %2117 = vmatpush3.msra.mxu0 %v351_v30  ;;  %v369_v27 = vld [vmem:[%s4203_s1 + $0x908] sm:$0xff]  ;;  %v384_v29 = vld [vmem:[%s4203_s1 + $0x980] sm:$0xff] }
  0x93   :  { %2155 = vmatpush3.msra.mxu1 %v383_v31  ;;  %2118 = vmatprep.subr.mxu0 %v366_v32  ;;  %v336_v30 = vld [vmem:[%s4203_s1 + $0x800] sm:$0xff]  ;;  %v33_v31 = vld [vmem:[%s4202_s0 + $0x88] sm:$0xff] }
  0x94   :  { %2156 = vmatprep.subr.mxu1 %v398_v33  ;;  %1113 = vmatprep.mubr.f32.mxu0 %v61_v34  ;;  %v368_v32 = vld [vmem:[%s4203_s1 + $0x900] sm:$0xff]  ;;  %v35_v34 = vld [vmem:[%s4202_s0 + $0x98] sm:$0xff] }
  0x95   :  { %2119 = vmatpush3.msra.mxu0 %v350_v35  ;;  %2157 = vmatpush3.msra.mxu1 %v382_v36  ;;  %v32_v33 = vld [vmem:[%s4202_s0 + $0x80] sm:$0xff]  ;;  %v431_v35 = vld [vmem:[%s4203_s1 + $0xaf8] sm:$0xff] }
  0x96   :  { %1114 = vmatmul.mubr.f32.gmra.mxu0 %v60_v37  ;;  %2120 = vmatprep.subr.mxu0 %v365_v38  ;;  %v463_v36 = vld [vmem:[%s4203_s1 + $0xbf8] sm:$0xff]  ;;  %v34_v37 = vld [vmem:[%s4202_s0 + $0x90] sm:$0xff] }
  0x97   :  { %2158 = vmatprep.subr.mxu1 %v397_v39  ;;  %1188 = vmatprep.mubr.f32.mxu1 %v63_v40  ;;  %v415_v38 = vld [vmem:[%s4203_s1 + $0xa78] sm:$0xff]  ;;  %v430_v40 = vld [vmem:[%s4203_s1 + $0xaf0] sm:$0xff] }
  0x98   :  { %2121 = vmatpush3.msra.mxu0 %v349_v41  ;;  %2159 = vmatpush3.msra.mxu1 %v381_v42  ;;  %v447_v39 = vld [vmem:[%s4203_s1 + $0xb78] sm:$0xff]  ;;  %v462_v41 = vld [vmem:[%s4203_s1 + $0xbf0] sm:$0xff]  ;;  %v65_v42 = vld [vmem:[%s4202_s0 + $0x188] sm:$0xff] }
  0x99   :  { %2122 = vmatprep.subr.mxu0 %v364_v43  ;;  %1189 = vmatmul.mubr.f32.gmra.mxu1 %v62_v44  ;;  %v414_v43 = vld [vmem:[%s4203_s1 + $0xa70] sm:$0xff] }
  0x9a   :  { %2160 = vmatprep.subr.mxu1 %v396_v45  ;;  %2123 = vmatpush3.msra.mxu0 %v348_v46  ;;  %v446_v44 = vld [vmem:[%s4203_s1 + $0xb70] sm:$0xff]  ;;  %v64_v45 = vld [vmem:[%s4202_s0 + $0x180] sm:$0xff]  ;;  %v429_v46 = vld [vmem:[%s4203_s1 + $0xae8] sm:$0xff] }
  0x9b   :  { %2161 = vmatpush3.msra.mxu1 %v380_v47  ;;  %2124 = vmatprep.subr.mxu0 %v363_v48  ;;  %v461_v47 = vld [vmem:[%s4203_s1 + $0xbe8] sm:$0xff]  ;;  %v67_v48 = vld [vmem:[%s4202_s0 + $0x198] sm:$0xff] }
  0x9c   :  { %2162 = vmatprep.subr.mxu1 %v395_v49  ;;  %2125 = vmatpush3.msra.mxu0 %v347_v50  ;;  %v413_v49 = vld [vmem:[%s4203_s1 + $0xa68] sm:$0xff] }
  0x9d   :  { %2163 = vmatpush3.msra.mxu1 %v379_v51  ;;  %2126 = vmatprep.subr.mxu0 %v362_v52  ;;  %v445_v50 = vld [vmem:[%s4203_s1 + $0xb68] sm:$0xff]  ;;  %v428_v51 = vld [vmem:[%s4203_s1 + $0xae0] sm:$0xff]  ;;  %v66_v52 = vld [vmem:[%s4202_s0 + $0x190] sm:$0xff] }
  0x9e   :  { %2164 = vmatprep.subr.mxu1 %v394_v53  ;;  %2127 = vmatpush3.msra.mxu0 %v346_v54  ;;  %v460_v53 = vld [vmem:[%s4203_s1 + $0xbe0] sm:$0xff] }
  0x9f   :  { %2165 = vmatpush3.msra.mxu1 %v378_v55  ;;  %2128 = vmatprep.subr.mxu0 %v361_v56  ;;  %v412_v54 = vld [vmem:[%s4203_s1 + $0xa60] sm:$0xff]  ;;  %v427_v56 = vld [vmem:[%s4203_s1 + $0xad8] sm:$0xff] }
  0xa0   :  { %2166 = vmatprep.subr.mxu1 %v393_v57  ;;  %2129 = vmatpush3.msra.mxu0 %v345_v58  ;;  %v444_v55 = vld [vmem:[%s4203_s1 + $0xb60] sm:$0xff]  ;;  %v459_v57 = vld [vmem:[%s4203_s1 + $0xbd8] sm:$0xff] }
  0xa1   :  { %2167 = vmatpush3.msra.mxu1 %v377_v59  ;;  %2130 = vmatprep.subr.mxu0 %v360_v60  ;;  %v411_v58 = vld [vmem:[%s4203_s1 + $0xa58] sm:$0xff]  ;;  %v426_v60 = vld [vmem:[%s4203_s1 + $0xad0] sm:$0xff] }
  0xa2   :  { %2168 = vmatprep.subr.mxu1 %v392_v61  ;;  %2131 = vmatpush3.msra.mxu0 %v344_v62  ;;  %v443_v59 = vld [vmem:[%s4203_s1 + $0xb58] sm:$0xff]  ;;  %v458_v61 = vld [vmem:[%s4203_s1 + $0xbd0] sm:$0xff] }
  0xa3   :  { %2169 = vmatpush3.msra.mxu1 %v376_v63  ;;  %2132 = vmatprep.subr.mxu0 %v359_v0  ;;  %v410_v62 = vld [vmem:[%s4203_s1 + $0xa50] sm:$0xff]  ;;  %v425_v0 = vld [vmem:[%s4203_s1 + $0xac8] sm:$0xff] }
  0xa4   :  { %2170 = vmatprep.subr.mxu1 %v391_v1  ;;  %2133 = vmatpush3.msra.mxu0 %v343_v2  ;;  %v442_v63 = vld [vmem:[%s4203_s1 + $0xb50] sm:$0xff]  ;;  %v457_v1 = vld [vmem:[%s4203_s1 + $0xbc8] sm:$0xff] }
  0xa5   :  { %2171 = vmatpush3.msra.mxu1 %v375_v3  ;;  %2134 = vmatprep.subr.mxu0 %v358_v4  ;;  %v409_v2 = vld [vmem:[%s4203_s1 + $0xa48] sm:$0xff]  ;;  %v424_v4 = vld [vmem:[%s4203_s1 + $0xac0] sm:$0xff] }
  0xa6   :  { %2172 = vmatprep.subr.mxu1 %v390_v5  ;;  %2135 = vmatpush3.msra.mxu0 %v342_v6  ;;  %v441_v3 = vld [vmem:[%s4203_s1 + $0xb48] sm:$0xff]  ;;  %v456_v5 = vld [vmem:[%s4203_s1 + $0xbc0] sm:$0xff] }
  0xa7   :  { %2173 = vmatpush3.msra.mxu1 %v374_v7  ;;  %2136 = vmatprep.subr.mxu0 %v357_v8 }
  0xa8   :  { %2174 = vmatprep.subr.mxu1 %v389_v9  ;;  %2137 = vmatpush3.msra.mxu0 %v341_v10 }
  0xa9   :  { %2175 = vmatpush3.msra.mxu1 %v373_v11  ;;  %2138 = vmatprep.subr.mxu0 %v356_v12 }
  0xaa   :  { %2176 = vmatprep.subr.mxu1 %v388_v13  ;;  %2139 = vmatpush3.msra.mxu0 %v340_v14 }
  0xab   :  { %2177 = vmatpush3.msra.mxu1 %v372_v15  ;;  %2140 = vmatprep.subr.mxu0 %v355_v16 }
  0xac   :  { %2178 = vmatprep.subr.mxu1 %v387_v17  ;;  %2141 = vmatpush3.msra.mxu0 %v339_v18 }
  0xad   :  { %2179 = vmatpush3.msra.mxu1 %v371_v19  ;;  %2142 = vmatprep.subr.mxu0 %v354_v20 }
  0xae   :  { %2180 = vmatprep.subr.mxu1 %v386_v21  ;;  %2143 = vmatpush3.msra.mxu0 %v338_v22 }
  0xaf   :  { %2181 = vmatpush3.msra.mxu1 %v370_v23  ;;  %2144 = vmatprep.subr.mxu0 %v353_v24 }
  0xb0   :  { %2182 = vmatprep.subr.mxu1 %v385_v25  ;;  %2145 = vmatpush3.msra.mxu0 %v337_v26 }
  0xb1   :  { %2183 = vmatpush3.msra.mxu1 %v369_v27  ;;  %2146 = vmatprep.subr.mxu0 %v352_v28 }
  0xb2   :  { %2184 = vmatprep.subr.mxu1 %v384_v29  ;;  %2147 = vmatpush3.msra.mxu0 %v336_v30 }
  0xb3   :  { %1258 = vmatprep.mubr.f32.mxu0 %v33_v31  ;;  %2185 = vmatpush3.msra.mxu1 %v368_v32 }
  0xb4   :  { %1259 = vmatmul.mubr.f32.vlgmr.msra.gmra.mxu0 %v32_v33  ;;  %1333 = vmatprep.mubr.f32.mxu1 %v35_v34 }
  0xb5   :  { %2192 = vmatprep.subr.mxu0 %v431_v35  ;;  %2230 = vmatprep.subr.mxu1 %v463_v36 }
  0xb6   :  { %1334 = vmatmul.mubr.f32.vlgmr.msra.gmra.mxu1 %v34_v37  ;;  %2193 = vmatpush3.msra.mxu0 %v415_v38 }
  0xb7   :  { %2231 = vmatpush3.msra.mxu1 %v447_v39  ;;  %2194 = vmatprep.subr.mxu0 %v430_v40 }
  0xb8   :  { %2232 = vmatprep.subr.mxu1 %v462_v41  ;;  %1263 = vmatprep.mubr.f32.mxu0 %v65_v42 }
  0xb9   :  { %2195 = vmatpush3.msra.mxu0 %v414_v43  ;;  %2233 = vmatpush3.msra.mxu1 %v446_v44 }
  0xba   :  { %1264 = vmatmul.mubr.f32.gmra.mxu0 %v64_v45  ;;  %2196 = vmatprep.subr.mxu0 %v429_v46 }
  0xbb   :  { %2234 = vmatprep.subr.mxu1 %v461_v47  ;;  %1338 = vmatprep.mubr.f32.mxu1 %v67_v48 }
  0xbc   :  { %2197 = vmatpush3.msra.mxu0 %v413_v49  ;;  %2235 = vmatpush3.msra.mxu1 %v445_v50 }
  0xbd   :  { %2198 = vmatprep.subr.mxu0 %v428_v51  ;;  %1339 = vmatmul.mubr.f32.gmra.mxu1 %v66_v52 }
  0xbe   :  { %2236 = vmatprep.subr.mxu1 %v460_v53  ;;  %2199 = vmatpush3.msra.mxu0 %v412_v54 }
  0xbf   :  { %2237 = vmatpush3.msra.mxu1 %v444_v55  ;;  %2200 = vmatprep.subr.mxu0 %v427_v56 }
  0xc0   :  { %2238 = vmatprep.subr.mxu1 %v459_v57  ;;  %2201 = vmatpush3.msra.mxu0 %v411_v58 }
  0xc1   :  { %2239 = vmatpush3.msra.mxu1 %v443_v59  ;;  %2202 = vmatprep.subr.mxu0 %v426_v60 }
  0xc2   :  { %2240 = vmatprep.subr.mxu1 %v458_v61  ;;  %2203 = vmatpush3.msra.mxu0 %v410_v62 }
  0xc3   :  { %2241 = vmatpush3.msra.mxu1 %v442_v63 }
  0xc4   :  { %9 = vsyncpa [#allocation4], 0  ;;  %2204 = vmatprep.subr.mxu0 %v425_v0  ;;  %2242 = vmatprep.subr.mxu1 %v457_v1  ;;  %v408_v6 = vld [vmem:[%s4203_s1 + $0xa40] sm:$0xff]  ;;  %v423_v8 = vld [vmem:[%s4203_s1 + $0xab8] sm:$0xff] }
  0xc5   :  { %v440_v7 = vld [vmem:[%s4203_s1 + $0xb40] sm:$0xff]  ;;  %2205 = vmatpush3.msra.mxu0 %v409_v2  ;;  %2243 = vmatpush3.msra.mxu1 %v441_v3  ;;  %v455_v9 = vld [vmem:[%s4203_s1 + $0xbb8] sm:$0xff]  ;;  %v422_v12 = vld [vmem:[%s4203_s1 + $0xab0] sm:$0xff] }
  0xc6   :  { %2206 = vmatprep.subr.mxu0 %v424_v4  ;;  %2244 = vmatprep.subr.mxu1 %v456_v5  ;;  %v407_v10 = vld [vmem:[%s4203_s1 + $0xa38] sm:$0xff]  ;;  %v454_v13 = vld [vmem:[%s4203_s1 + $0xbb0] sm:$0xff]  ;;  %v421_v16 = vld [vmem:[%s4203_s1 + $0xaa8] sm:$0xff] }
  0xc7   :  { %v439_v11 = vld [vmem:[%s4203_s1 + $0xb38] sm:$0xff]  ;;  %2207 = vmatpush3.msra.mxu0 %v408_v6  ;;  %2245 = vmatpush3.msra.mxu1 %v440_v7  ;;  %v406_v14 = vld [vmem:[%s4203_s1 + $0xa30] sm:$0xff]  ;;  %v453_v17 = vld [vmem:[%s4203_s1 + $0xba8] sm:$0xff] }
  0xc8   :  { %2208 = vmatprep.subr.mxu0 %v423_v8  ;;  %2246 = vmatprep.subr.mxu1 %v455_v9  ;;  %v438_v15 = vld [vmem:[%s4203_s1 + $0xb30] sm:$0xff]  ;;  %v405_v18 = vld [vmem:[%s4203_s1 + $0xa28] sm:$0xff]  ;;  %v420_v20 = vld [vmem:[%s4203_s1 + $0xaa0] sm:$0xff] }
  0xc9   :  { %2209 = vmatpush3.msra.mxu0 %v407_v10  ;;  %2247 = vmatpush3.msra.mxu1 %v439_v11  ;;  %v437_v19 = vld [vmem:[%s4203_s1 + $0xb28] sm:$0xff]  ;;  %v452_v21 = vld [vmem:[%s4203_s1 + $0xba0] sm:$0xff]  ;;  %v419_v24 = vld [vmem:[%s4203_s1 + $0xa98] sm:$0xff] }
  0xca   :  { %2210 = vmatprep.subr.mxu0 %v422_v12  ;;  %2248 = vmatprep.subr.mxu1 %v454_v13  ;;  %v404_v22 = vld [vmem:[%s4203_s1 + $0xa20] sm:$0xff]  ;;  %v451_v25 = vld [vmem:[%s4203_s1 + $0xb98] sm:$0xff]  ;;  %v418_v28 = vld [vmem:[%s4203_s1 + $0xa90] sm:$0xff] }
  0xcb   :  { %2211 = vmatpush3.msra.mxu0 %v406_v14  ;;  %2249 = vmatpush3.msra.mxu1 %v438_v15  ;;  %v436_v23 = vld [vmem:[%s4203_s1 + $0xb20] sm:$0xff]  ;;  %v403_v26 = vld [vmem:[%s4203_s1 + $0xa18] sm:$0xff]  ;;  %v450_v29 = vld [vmem:[%s4203_s1 + $0xb90] sm:$0xff] }
  0xcc   :  { %2212 = vmatprep.subr.mxu0 %v421_v16  ;;  %2250 = vmatprep.subr.mxu1 %v453_v17  ;;  %v435_v27 = vld [vmem:[%s4203_s1 + $0xb18] sm:$0xff]  ;;  %v402_v30 = vld [vmem:[%s4203_s1 + $0xa10] sm:$0xff]  ;;  %v417_v32 = vld [vmem:[%s4203_s1 + $0xa88] sm:$0xff] }
  0xcd   :  { %2213 = vmatpush3.msra.mxu0 %v405_v18  ;;  %2251 = vmatpush3.msra.mxu1 %v437_v19  ;;  %v434_v31 = vld [vmem:[%s4203_s1 + $0xb10] sm:$0xff]  ;;  %v449_v33 = vld [vmem:[%s4203_s1 + $0xb88] sm:$0xff]  ;;  %v416_v36 = vld [vmem:[%s4203_s1 + $0xa80] sm:$0xff] }
  0xce   :  { %2214 = vmatprep.subr.mxu0 %v420_v20  ;;  %2252 = vmatprep.subr.mxu1 %v452_v21  ;;  %v401_v34 = vld [vmem:[%s4203_s1 + $0xa08] sm:$0xff]  ;;  %v448_v37 = vld [vmem:[%s4203_s1 + $0xb80] sm:$0xff]  ;;  %v39_v42 = vld [vmem:[%s4202_s0 + $0xb8] sm:$0xff] }
  0xcf   :  { %2215 = vmatpush3.msra.mxu0 %v404_v22  ;;  %2253 = vmatpush3.msra.mxu1 %v436_v23  ;;  %v433_v35 = vld [vmem:[%s4203_s1 + $0xb08] sm:$0xff]  ;;  %v400_v38 = vld [vmem:[%s4203_s1 + $0xa00] sm:$0xff]  ;;  %v495_v43 = vld [vmem:[%s4203_s1 + $0xcf8] sm:$0xff] }
  0xd0   :  { %2216 = vmatprep.subr.mxu0 %v419_v24  ;;  %2254 = vmatprep.subr.mxu1 %v451_v25  ;;  %v37_v39 = vld [vmem:[%s4202_s0 + $0xa8] sm:$0xff]  ;;  %v432_v40 = vld [vmem:[%s4203_s1 + $0xb00] sm:$0xff]  ;;  %v527_v44 = vld [vmem:[%s4203_s1 + $0xdf8] sm:$0xff] }
  0xd1   :  { %2217 = vmatpush3.msra.mxu0 %v403_v26  ;;  %2255 = vmatpush3.msra.mxu1 %v435_v27  ;;  %v36_v41 = vld [vmem:[%s4202_s0 + $0xa0] sm:$0xff]  ;;  %v38_v45 = vld [vmem:[%s4202_s0 + $0xb0] sm:$0xff]  ;;  %v479_v46 = vld [vmem:[%s4203_s1 + $0xc78] sm:$0xff] }
  0xd2   :  { %2218 = vmatprep.subr.mxu0 %v418_v28  ;;  %2256 = vmatprep.subr.mxu1 %v450_v29  ;;  %v511_v47 = vld [vmem:[%s4203_s1 + $0xd78] sm:$0xff]  ;;  %v494_v48 = vld [vmem:[%s4203_s1 + $0xcf0] sm:$0xff]  ;;  %v69_v50 = vld [vmem:[%s4202_s0 + $0x1a8] sm:$0xff] }
  0xd3   :  { %2219 = vmatpush3.msra.mxu0 %v402_v30  ;;  %2257 = vmatpush3.msra.mxu1 %v434_v31  ;;  %v526_v49 = vld [vmem:[%s4203_s1 + $0xdf0] sm:$0xff]  ;;  %v68_v53 = vld [vmem:[%s4202_s0 + $0x1a0] sm:$0xff]  ;;  %v493_v54 = vld [vmem:[%s4203_s1 + $0xce8] sm:$0xff] }
  0xd4   :  { %2220 = vmatprep.subr.mxu0 %v417_v32  ;;  %2258 = vmatprep.subr.mxu1 %v449_v33  ;;  %v478_v51 = vld [vmem:[%s4203_s1 + $0xc70] sm:$0xff]  ;;  %v525_v55 = vld [vmem:[%s4203_s1 + $0xde8] sm:$0xff]  ;;  %v71_v56 = vld [vmem:[%s4202_s0 + $0x1b8] sm:$0xff] }
  0xd5   :  { %2221 = vmatpush3.msra.mxu0 %v401_v34  ;;  %2259 = vmatpush3.msra.mxu1 %v433_v35  ;;  %v510_v52 = vld [vmem:[%s4203_s1 + $0xd70] sm:$0xff]  ;;  %v477_v57 = vld [vmem:[%s4203_s1 + $0xc68] sm:$0xff]  ;;  %v492_v59 = vld [vmem:[%s4203_s1 + $0xce0] sm:$0xff] }
  0xd6   :  { %2222 = vmatprep.subr.mxu0 %v416_v36  ;;  %2260 = vmatprep.subr.mxu1 %v448_v37  ;;  %v509_v58 = vld [vmem:[%s4203_s1 + $0xd68] sm:$0xff]  ;;  %v70_v60 = vld [vmem:[%s4202_s0 + $0x1b0] sm:$0xff]  ;;  %v524_v61 = vld [vmem:[%s4203_s1 + $0xde0] sm:$0xff] }
  0xd7   :  { %2223 = vmatpush3.msra.mxu0 %v400_v38  ;;  %1408 = vmatprep.mubr.f32.mxu0 %v37_v39  ;;  %v476_v62 = vld [vmem:[%s4203_s1 + $0xc60] sm:$0xff]  ;;  %v491_v0 = vld [vmem:[%s4203_s1 + $0xcd8] sm:$0xff]  ;;  %v490_v4 = vld [vmem:[%s4203_s1 + $0xcd0] sm:$0xff] }
  0xd8   :  { %2261 = vmatpush3.msra.mxu1 %v432_v40  ;;  %1409 = vmatmul.mubr.f32.vlgmr.msra.gmra.mxu0 %v36_v41  ;;  %v508_v63 = vld [vmem:[%s4203_s1 + $0xd60] sm:$0xff]  ;;  %v523_v1 = vld [vmem:[%s4203_s1 + $0xdd8] sm:$0xff]  ;;  %v522_v5 = vld [vmem:[%s4203_s1 + $0xdd0] sm:$0xff] }
  0xd9   :  { %1483 = vmatprep.mubr.f32.mxu1 %v39_v42  ;;  %2268 = vmatprep.subr.mxu0 %v495_v43  ;;  %v475_v2 = vld [vmem:[%s4203_s1 + $0xc58] sm:$0xff]  ;;  %v474_v6 = vld [vmem:[%s4203_s1 + $0xc50] sm:$0xff]  ;;  %v489_v8 = vld [vmem:[%s4203_s1 + $0xcc8] sm:$0xff] }
  0xda   :  { %2306 = vmatprep.subr.mxu1 %v527_v44  ;;  %1484 = vmatmul.mubr.f32.vlgmr.msra.gmra.mxu1 %v38_v45  ;;  %v507_v3 = vld [vmem:[%s4203_s1 + $0xd58] sm:$0xff]  ;;  %v506_v7 = vld [vmem:[%s4203_s1 + $0xd50] sm:$0xff]  ;;  %v521_v9 = vld [vmem:[%s4203_s1 + $0xdc8] sm:$0xff] }
  0xdb   :  { %2269 = vmatpush3.msra.mxu0 %v479_v46  ;;  %2307 = vmatpush3.msra.mxu1 %v511_v47  ;;  %v473_v10 = vld [vmem:[%s4203_s1 + $0xc48] sm:$0xff]  ;;  %v488_v12 = vld [vmem:[%s4203_s1 + $0xcc0] sm:$0xff]  ;;  %v487_v16 = vld [vmem:[%s4203_s1 + $0xcb8] sm:$0xff] }
  0xdc   :  { %2270 = vmatprep.subr.mxu0 %v494_v48  ;;  %2308 = vmatprep.subr.mxu1 %v526_v49  ;;  %v505_v11 = vld [vmem:[%s4203_s1 + $0xd48] sm:$0xff]  ;;  %v520_v13 = vld [vmem:[%s4203_s1 + $0xdc0] sm:$0xff]  ;;  %v519_v17 = vld [vmem:[%s4203_s1 + $0xdb8] sm:$0xff] }
  0xdd   :  { %1413 = vmatprep.mubr.f32.mxu0 %v69_v50  ;;  %2271 = vmatpush3.msra.mxu0 %v478_v51  ;;  %v472_v14 = vld [vmem:[%s4203_s1 + $0xc40] sm:$0xff]  ;;  %v471_v18 = vld [vmem:[%s4203_s1 + $0xc38] sm:$0xff]  ;;  %v486_v20 = vld [vmem:[%s4203_s1 + $0xcb0] sm:$0xff] }
  0xde   :  { %2309 = vmatpush3.msra.mxu1 %v510_v52  ;;  %1414 = vmatmul.mubr.f32.gmra.mxu0 %v68_v53  ;;  %v504_v15 = vld [vmem:[%s4203_s1 + $0xd40] sm:$0xff]  ;;  %v503_v19 = vld [vmem:[%s4203_s1 + $0xd38] sm:$0xff]  ;;  %v518_v21 = vld [vmem:[%s4203_s1 + $0xdb0] sm:$0xff] }
  0xdf   :  { %2272 = vmatprep.subr.mxu0 %v493_v54  ;;  %2310 = vmatprep.subr.mxu1 %v525_v55  ;;  %v470_v22 = vld [vmem:[%s4203_s1 + $0xc30] sm:$0xff]  ;;  %v485_v24 = vld [vmem:[%s4203_s1 + $0xca8] sm:$0xff]  ;;  %v484_v28 = vld [vmem:[%s4203_s1 + $0xca0] sm:$0xff] }
  0xe0   :  { %1488 = vmatprep.mubr.f32.mxu1 %v71_v56  ;;  %2273 = vmatpush3.msra.mxu0 %v477_v57  ;;  %v502_v23 = vld [vmem:[%s4203_s1 + $0xd30] sm:$0xff]  ;;  %v517_v25 = vld [vmem:[%s4203_s1 + $0xda8] sm:$0xff]  ;;  %v516_v29 = vld [vmem:[%s4203_s1 + $0xda0] sm:$0xff] }
  0xe1   :  { %2311 = vmatpush3.msra.mxu1 %v509_v58  ;;  %2274 = vmatprep.subr.mxu0 %v492_v59  ;;  %v469_v26 = vld [vmem:[%s4203_s1 + $0xc28] sm:$0xff]  ;;  %v468_v30 = vld [vmem:[%s4203_s1 + $0xc20] sm:$0xff]  ;;  %v483_v32 = vld [vmem:[%s4203_s1 + $0xc98] sm:$0xff] }
  0xe2   :  { %1489 = vmatmul.mubr.f32.gmra.mxu1 %v70_v60  ;;  %2312 = vmatprep.subr.mxu1 %v524_v61  ;;  %v501_v27 = vld [vmem:[%s4203_s1 + $0xd28] sm:$0xff]  ;;  %v500_v31 = vld [vmem:[%s4203_s1 + $0xd20] sm:$0xff]  ;;  %v515_v33 = vld [vmem:[%s4203_s1 + $0xd98] sm:$0xff] }
  0xe3   :  { %2275 = vmatpush3.msra.mxu0 %v476_v62  ;;  %2313 = vmatpush3.msra.mxu1 %v508_v63  ;;  %v467_v34 = vld [vmem:[%s4203_s1 + $0xc18] sm:$0xff]  ;;  %v482_v36 = vld [vmem:[%s4203_s1 + $0xc90] sm:$0xff]  ;;  %v481_v40 = vld [vmem:[%s4203_s1 + $0xc88] sm:$0xff] }
  0xe4   :  { %2276 = vmatprep.subr.mxu0 %v491_v0  ;;  %2314 = vmatprep.subr.mxu1 %v523_v1  ;;  %v499_v35 = vld [vmem:[%s4203_s1 + $0xd18] sm:$0xff]  ;;  %v514_v37 = vld [vmem:[%s4203_s1 + $0xd90] sm:$0xff]  ;;  %v513_v41 = vld [vmem:[%s4203_s1 + $0xd88] sm:$0xff] }
  0xe5   :  { %2277 = vmatpush3.msra.mxu0 %v475_v2  ;;  %2315 = vmatpush3.msra.mxu1 %v507_v3  ;;  %v466_v38 = vld [vmem:[%s4203_s1 + $0xc10] sm:$0xff]  ;;  %v465_v42 = vld [vmem:[%s4203_s1 + $0xc08] sm:$0xff]  ;;  %v480_v44 = vld [vmem:[%s4203_s1 + $0xc80] sm:$0xff] }
  0xe6   :  { %2278 = vmatprep.subr.mxu0 %v490_v4  ;;  %2316 = vmatprep.subr.mxu1 %v522_v5  ;;  %v498_v39 = vld [vmem:[%s4203_s1 + $0xd10] sm:$0xff]  ;;  %v497_v43 = vld [vmem:[%s4203_s1 + $0xd08] sm:$0xff]  ;;  %v512_v45 = vld [vmem:[%s4203_s1 + $0xd80] sm:$0xff] }
  0xe7   :  { %2279 = vmatpush3.msra.mxu0 %v474_v6  ;;  %2317 = vmatpush3.msra.mxu1 %v506_v7  ;;  %v464_v46 = vld [vmem:[%s4203_s1 + $0xc00] sm:$0xff]  ;;  %v41_v47 = vld [vmem:[%s4202_s0 + $0xc8] sm:$0xff]  ;;  %v43_v50 = vld [vmem:[%s4202_s0 + $0xd8] sm:$0xff] }
  0xe8   :  { %2280 = vmatprep.subr.mxu0 %v489_v8  ;;  %2318 = vmatprep.subr.mxu1 %v521_v9  ;;  %v496_v48 = vld [vmem:[%s4203_s1 + $0xd00] sm:$0xff]  ;;  %v559_v51 = vld [vmem:[%s4203_s1 + $0xef8] sm:$0xff]  ;;  %v42_v53 = vld [vmem:[%s4202_s0 + $0xd0] sm:$0xff] }
  0xe9   :  { %2281 = vmatpush3.msra.mxu0 %v473_v10  ;;  %2319 = vmatpush3.msra.mxu1 %v505_v11  ;;  %v40_v49 = vld [vmem:[%s4202_s0 + $0xc0] sm:$0xff]  ;;  %v591_v52 = vld [vmem:[%s4203_s1 + $0xff8] sm:$0xff]  ;;  %v558_v56 = vld [vmem:[%s4203_s1 + $0xef0] sm:$0xff] }
  0xea   :  { %2282 = vmatprep.subr.mxu0 %v488_v12  ;;  %2320 = vmatprep.subr.mxu1 %v520_v13  ;;  %v543_v54 = vld [vmem:[%s4203_s1 + $0xe78] sm:$0xff]  ;;  %v590_v57 = vld [vmem:[%s4203_s1 + $0xff0] sm:$0xff]  ;;  %v73_v58 = vld [vmem:[%s4202_s0 + $0x1c8] sm:$0xff] }
  0xeb   :  { %2283 = vmatpush3.msra.mxu0 %v472_v14  ;;  %2321 = vmatpush3.msra.mxu1 %v504_v15  ;;  %v575_v55 = vld [vmem:[%s4203_s1 + $0xf78] sm:$0xff]  ;;  %v542_v59 = vld [vmem:[%s4203_s1 + $0xe70] sm:$0xff]  ;;  %v72_v61 = vld [vmem:[%s4202_s0 + $0x1c0] sm:$0xff] }
  0xec   :  { %2284 = vmatprep.subr.mxu0 %v487_v16  ;;  %2322 = vmatprep.subr.mxu1 %v519_v17  ;;  %v574_v60 = vld [vmem:[%s4203_s1 + $0xf70] sm:$0xff]  ;;  %v557_v62 = vld [vmem:[%s4203_s1 + $0xee8] sm:$0xff]  ;;  %v75_v0 = vld [vmem:[%s4202_s0 + $0x1d8] sm:$0xff] }
  0xed   :  { %2285 = vmatpush3.msra.mxu0 %v471_v18  ;;  %2323 = vmatpush3.msra.mxu1 %v503_v19  ;;  %v589_v63 = vld [vmem:[%s4203_s1 + $0xfe8] sm:$0xff]  ;;  %v556_v3 = vld [vmem:[%s4203_s1 + $0xee0] sm:$0xff]  ;;  %v74_v4 = vld [vmem:[%s4202_s0 + $0x1d0] sm:$0xff] }
  0xee   :  { %2286 = vmatprep.subr.mxu0 %v486_v20  ;;  %2324 = vmatprep.subr.mxu1 %v518_v21  ;;  %v541_v1 = vld [vmem:[%s4203_s1 + $0xe68] sm:$0xff]  ;;  %v588_v5 = vld [vmem:[%s4203_s1 + $0xfe0] sm:$0xff]  ;;  %v555_v8 = vld [vmem:[%s4203_s1 + $0xed8] sm:$0xff] }
  0xef   :  { %2287 = vmatpush3.msra.mxu0 %v470_v22  ;;  %2325 = vmatpush3.msra.mxu1 %v502_v23  ;;  %v573_v2 = vld [vmem:[%s4203_s1 + $0xf68] sm:$0xff]  ;;  %v540_v6 = vld [vmem:[%s4203_s1 + $0xe60] sm:$0xff]  ;;  %v587_v9 = vld [vmem:[%s4203_s1 + $0xfd8] sm:$0xff] }
  0xf0   :  { %2288 = vmatprep.subr.mxu0 %v485_v24  ;;  %2326 = vmatprep.subr.mxu1 %v517_v25  ;;  %v572_v7 = vld [vmem:[%s4203_s1 + $0xf60] sm:$0xff]  ;;  %v539_v10 = vld [vmem:[%s4203_s1 + $0xe58] sm:$0xff]  ;;  %v554_v12 = vld [vmem:[%s4203_s1 + $0xed0] sm:$0xff] }
  0xf1   :  { %2289 = vmatpush3.msra.mxu0 %v469_v26  ;;  %2327 = vmatpush3.msra.mxu1 %v501_v27  ;;  %v571_v11 = vld [vmem:[%s4203_s1 + $0xf58] sm:$0xff]  ;;  %v586_v13 = vld [vmem:[%s4203_s1 + $0xfd0] sm:$0xff]  ;;  %v553_v16 = vld [vmem:[%s4203_s1 + $0xec8] sm:$0xff] }
  0xf2   :  { %2290 = vmatprep.subr.mxu0 %v484_v28  ;;  %2328 = vmatprep.subr.mxu1 %v516_v29  ;;  %v538_v14 = vld [vmem:[%s4203_s1 + $0xe50] sm:$0xff]  ;;  %v585_v17 = vld [vmem:[%s4203_s1 + $0xfc8] sm:$0xff]  ;;  %v552_v20 = vld [vmem:[%s4203_s1 + $0xec0] sm:$0xff] }
  0xf3   :  { %2291 = vmatpush3.msra.mxu0 %v468_v30  ;;  %2329 = vmatpush3.msra.mxu1 %v500_v31  ;;  %v570_v15 = vld [vmem:[%s4203_s1 + $0xf50] sm:$0xff]  ;;  %v537_v18 = vld [vmem:[%s4203_s1 + $0xe48] sm:$0xff]  ;;  %v584_v21 = vld [vmem:[%s4203_s1 + $0xfc0] sm:$0xff] }
  0xf4   :  { %2292 = vmatprep.subr.mxu0 %v483_v32  ;;  %2330 = vmatprep.subr.mxu1 %v515_v33  ;;  %v569_v19 = vld [vmem:[%s4203_s1 + $0xf48] sm:$0xff]  ;;  %v536_v22 = vld [vmem:[%s4203_s1 + $0xe40] sm:$0xff]  ;;  %v551_v24 = vld [vmem:[%s4203_s1 + $0xeb8] sm:$0xff] }
  0xf5   :  { %2293 = vmatpush3.msra.mxu0 %v467_v34  ;;  %2331 = vmatpush3.msra.mxu1 %v499_v35  ;;  %v568_v23 = vld [vmem:[%s4203_s1 + $0xf40] sm:$0xff]  ;;  %v583_v25 = vld [vmem:[%s4203_s1 + $0xfb8] sm:$0xff]  ;;  %v550_v28 = vld [vmem:[%s4203_s1 + $0xeb0] sm:$0xff] }
  0xf6   :  { %2294 = vmatprep.subr.mxu0 %v482_v36  ;;  %2332 = vmatprep.subr.mxu1 %v514_v37  ;;  %v535_v26 = vld [vmem:[%s4203_s1 + $0xe38] sm:$0xff]  ;;  %v582_v29 = vld [vmem:[%s4203_s1 + $0xfb0] sm:$0xff]  ;;  %v549_v32 = vld [vmem:[%s4203_s1 + $0xea8] sm:$0xff] }
  0xf7   :  { %2295 = vmatpush3.msra.mxu0 %v466_v38  ;;  %2333 = vmatpush3.msra.mxu1 %v498_v39  ;;  %v567_v27 = vld [vmem:[%s4203_s1 + $0xf38] sm:$0xff]  ;;  %v534_v30 = vld [vmem:[%s4203_s1 + $0xe30] sm:$0xff]  ;;  %v581_v33 = vld [vmem:[%s4203_s1 + $0xfa8] sm:$0xff] }
  0xf8   :  { %2296 = vmatprep.subr.mxu0 %v481_v40  ;;  %2334 = vmatprep.subr.mxu1 %v513_v41  ;;  %v566_v31 = vld [vmem:[%s4203_s1 + $0xf30] sm:$0xff]  ;;  %v533_v34 = vld [vmem:[%s4203_s1 + $0xe28] sm:$0xff]  ;;  %v548_v36 = vld [vmem:[%s4203_s1 + $0xea0] sm:$0xff] }
  0xf9   :  { %2297 = vmatpush3.msra.mxu0 %v465_v42  ;;  %2335 = vmatpush3.msra.mxu1 %v497_v43  ;;  %v565_v35 = vld [vmem:[%s4203_s1 + $0xf28] sm:$0xff]  ;;  %v580_v37 = vld [vmem:[%s4203_s1 + $0xfa0] sm:$0xff]  ;;  %v547_v40 = vld [vmem:[%s4203_s1 + $0xe98] sm:$0xff] }
  0xfa   :  { %2298 = vmatprep.subr.mxu0 %v480_v44  ;;  %2336 = vmatprep.subr.mxu1 %v512_v45  ;;  %v532_v38 = vld [vmem:[%s4203_s1 + $0xe20] sm:$0xff]  ;;  %v579_v41 = vld [vmem:[%s4203_s1 + $0xf98] sm:$0xff]  ;;  %v546_v44 = vld [vmem:[%s4203_s1 + $0xe90] sm:$0xff] }
  0xfb   :  { %2299 = vmatpush3.msra.mxu0 %v464_v46  ;;  %1558 = vmatprep.mubr.f32.mxu0 %v41_v47  ;;  %v564_v39 = vld [vmem:[%s4203_s1 + $0xf20] sm:$0xff]  ;;  %v531_v42 = vld [vmem:[%s4203_s1 + $0xe18] sm:$0xff]  ;;  %v578_v45 = vld [vmem:[%s4203_s1 + $0xf90] sm:$0xff] }
  0xfc   :  { %2337 = vmatpush3.msra.mxu1 %v496_v48  ;;  %1559 = vmatmul.mubr.f32.vlgmr.msra.gmra.mxu0 %v40_v49  ;;  %v563_v43 = vld [vmem:[%s4203_s1 + $0xf18] sm:$0xff]  ;;  %v530_v46 = vld [vmem:[%s4203_s1 + $0xe10] sm:$0xff]  ;;  %v545_v48 = vld [vmem:[%s4203_s1 + $0xe88] sm:$0xff] }
  0xfd   :  { %1633 = vmatprep.mubr.f32.mxu1 %v43_v50  ;;  %2344 = vmatprep.subr.mxu0 %v559_v51  ;;  %v562_v47 = vld [vmem:[%s4203_s1 + $0xf10] sm:$0xff]  ;;  %v577_v49 = vld [vmem:[%s4203_s1 + $0xf88] sm:$0xff] }
  0xfe   :  { %2382 = vmatprep.subr.mxu1 %v591_v52  ;;  %1634 = vmatmul.mubr.f32.vlgmr.msra.gmra.mxu1 %v42_v53  ;;  %v529_v50 = vld [vmem:[%s4203_s1 + $0xe08] sm:$0xff]  ;;  %v544_v52 = vld [vmem:[%s4203_s1 + $0xe80] sm:$0xff] }
  0xff   :  { %2345 = vmatpush3.msra.mxu0 %v543_v54  ;;  %2383 = vmatpush3.msra.mxu1 %v575_v55  ;;  %v561_v51 = vld [vmem:[%s4203_s1 + $0xf08] sm:$0xff]  ;;  %v576_v53 = vld [vmem:[%s4203_s1 + $0xf80] sm:$0xff] }
 0x100   :  { %2346 = vmatprep.subr.mxu0 %v558_v56  ;;  %2384 = vmatprep.subr.mxu1 %v590_v57  ;;  %v528_v54 = vld [vmem:[%s4203_s1 + $0xe00] sm:$0xff]  ;;  %v45_v55 = vld [vmem:[%s4202_s0 + $0xe8] sm:$0xff]  ;;  %v47_v57 = vld [vmem:[%s4202_s0 + $0xf8] sm:$0xff] }
 0x101   :  { %1563 = vmatprep.mubr.f32.mxu0 %v73_v58  ;;  %2347 = vmatpush3.msra.mxu0 %v542_v59  ;;  %v560_v56 = vld [vmem:[%s4203_s1 + $0xf00] sm:$0xff]  ;;  %v46_v59 = vld [vmem:[%s4202_s0 + $0xf0] sm:$0xff] }
 0x102   :  { %2385 = vmatpush3.msra.mxu1 %v574_v60  ;;  %1564 = vmatmul.mubr.f32.gmra.mxu0 %v72_v61  ;;  %v44_v58 = vld [vmem:[%s4202_s0 + $0xe0] sm:$0xff]  ;;  %v77_v60 = vld [vmem:[%s4202_s0 + $0x1e8] sm:$0xff]  ;;  %v79_v61 = vld [vmem:[%s4202_s0 + $0x1f8] sm:$0xff] }
 0x103   :  { %2348 = vmatprep.subr.mxu0 %v557_v62  ;;  %2386 = vmatprep.subr.mxu1 %v589_v63  ;;  %v76_v62 = vld [vmem:[%s4202_s0 + $0x1e0] sm:$0xff]  ;;  %v78_v63 = vld [vmem:[%s4202_s0 + $0x1f0] sm:$0xff] }
 0x104   :  { %1638 = vmatprep.mubr.f32.mxu1 %v75_v0  ;;  %2349 = vmatpush3.msra.mxu0 %v541_v1  ;;  %v1844_v0 = vpop.f32.mrf.mxu0  ;;  %v1882_v1 = vpop.f32.mrf.mxu1 }
 0x105   :  { %2387 = vmatpush3.msra.mxu1 %v573_v2  ;;  %2350 = vmatprep.subr.mxu0 %v556_v3 }
 0x106   :  { %1639 = vmatmul.mubr.f32.gmra.mxu1 %v74_v4  ;;  %2388 = vmatprep.subr.mxu1 %v588_v5  ;;  %v1845_v2 = vpop.f32.mrf.mxu0  ;;  %v1883_v3 = vpop.f32.mrf.mxu1 }
 0x107   :  { %2351 = vmatpush3.msra.mxu0 %v540_v6  ;;  %2389 = vmatpush3.msra.mxu1 %v572_v7 }
 0x108   :  { %2352 = vmatprep.subr.mxu0 %v555_v8  ;;  %2390 = vmatprep.subr.mxu1 %v587_v9  ;;  %v1847_v4 = vpop.f32.mrf.mxu0  ;;  %v1885_v5 = vpop.f32.mrf.mxu1 }
 0x109   :  { %2353 = vmatpush3.msra.mxu0 %v539_v10  ;;  %2391 = vmatpush3.msra.mxu1 %v571_v11 }
 0x10a   :  { %2354 = vmatprep.subr.mxu0 %v554_v12  ;;  %2392 = vmatprep.subr.mxu1 %v586_v13  ;;  %v1848_v6 = vpop.f32.mrf.mxu0  ;;  %v1886_v7 = vpop.f32.mrf.mxu1 }
 0x10b   :  { %2355 = vmatpush3.msra.mxu0 %v538_v14  ;;  %2393 = vmatpush3.msra.mxu1 %v570_v15 }
 0x10c   :  { %2356 = vmatprep.subr.mxu0 %v553_v16  ;;  %2394 = vmatprep.subr.mxu1 %v585_v17  ;;  %v1920_v8 = vpop.f32.mrf.mxu0  ;;  %v1958_v9 = vpop.f32.mrf.mxu1 }
 0x10d   :  { %2357 = vmatpush3.msra.mxu0 %v537_v18  ;;  %2395 = vmatpush3.msra.mxu1 %v569_v19 }
 0x10e   :  { %2358 = vmatprep.subr.mxu0 %v552_v20  ;;  %2396 = vmatprep.subr.mxu1 %v584_v21  ;;  %v1921_v10 = vpop.f32.mrf.mxu0  ;;  %v1959_v11 = vpop.f32.mrf.mxu1 }
 0x10f   :  { %2359 = vmatpush3.msra.mxu0 %v536_v22  ;;  %2397 = vmatpush3.msra.mxu1 %v568_v23 }
 0x110   :  { %2360 = vmatprep.subr.mxu0 %v551_v24  ;;  %2398 = vmatprep.subr.mxu1 %v583_v25  ;;  %v1923_v12 = vpop.f32.mrf.mxu0 }
 0x111   :  { %2361 = vmatpush3.msra.mxu0 %v535_v26  ;;  %2399 = vmatpush3.msra.mxu1 %v567_v27  ;;  %v1961_v13 = vpop.f32.mrf.mxu1 }
 0x112   :  { %2362 = vmatprep.subr.mxu0 %v550_v28  ;;  %2400 = vmatprep.subr.mxu1 %v582_v29  ;;  %v1924_v14 = vpop.f32.mrf.mxu0 }
 0x113   :  { %2363 = vmatpush3.msra.mxu0 %v534_v30  ;;  %2401 = vmatpush3.msra.mxu1 %v566_v31  ;;  %v1962_v15 = vpop.f32.mrf.mxu1 }
 0x114   :  { %2364 = vmatprep.subr.mxu0 %v549_v32  ;;  %2402 = vmatprep.subr.mxu1 %v581_v33 }
 0x115   :  { %2365 = vmatpush3.msra.mxu0 %v533_v34  ;;  %2403 = vmatpush3.msra.mxu1 %v565_v35  ;;  %v1846_v34 = vadd.f32 %v1845_v2, %v1844_v0  ;;  %v593_v35 = vstv %s4204_s2  ;;  %s2445_s2 = smov [#allocation3]  }
 0x116   :  { %2366 = vmatprep.subr.mxu0 %v548_v36  ;;  %2404 = vmatprep.subr.mxu1 %v580_v37  ;;  %s1801_s30 = sshll.u32 %s2445_s2, 4  ;;  %s1802_s30 = int_to_ptr.vmem [resolvable:$true] %s1801_s30 }
 0x117   :  { %2367 = vmatpush3.msra.mxu0 %v532_v38  ;;  %2405 = vmatpush3.msra.mxu1 %v564_v39  ;;  %v661_v38 = vadd.f32 %v1846_v34, %v593_v35  ;;  %v1884_v39 = vadd.f32 %v1883_v3, %v1882_v1  ;;  %s2423_s4 = scalar_lea.vmem %s1802_s30, 256  ;;  %p2428_p1 = scmp.lt.s32.totalorder %s1802_s30, %s1802_s30 }
 0x118   :  { %2368 = vmatprep.subr.mxu0 %v547_v40  ;;  %2406 = vmatprep.subr.mxu1 %v579_v41  ;;  %v1849_v40 = vadd.f32 %v1848_v6, %v1847_v4  ;;  %p2424_p0 = scmp.ne.s32.totalorder %s1802_s30, %s2423_s4  ;;  %p2429_p2 = scmp.lt.s32.totalorder %s2423_s4, %s2423_s4 }
 0x119   :  { %2369 = vmatpush3.msra.mxu0 %v531_v42  ;;  %2407 = vmatpush3.msra.mxu1 %v563_v43  ;;  %v1922_v42 = vadd.f32 %v1921_v10, %v1920_v8 }
 0x11a   :  { %2370 = vmatprep.subr.mxu0 %v546_v44  ;;  %2408 = vmatprep.subr.mxu1 %v578_v45  ;;  %v736_v44 = vadd.f32 %v1884_v39, %v661_v38  ;;  %v666_v45 = vadd.f32 %v1849_v40, %v593_v35  ;;  %p2430_p3 = por %p2429_p2, %p2428_p1 }
 0x11b   :  { %2371 = vmatpush3.msra.mxu0 %v530_v46  ;;  %2409 = vmatpush3.msra.mxu1 %v562_v47  ;;  %v1887_v46 = vadd.f32 %v1886_v7, %v1885_v5 }
 0x11c   :  { %2372 = vmatprep.subr.mxu0 %v545_v48  ;;  %2410 = vmatprep.subr.mxu1 %v577_v49  ;;  %v811_v48 = vadd.f32 %v1922_v42, %v736_v44  ;;  %v1960_v49 = vadd.f32 %v1959_v11, %v1958_v9  ;;  %p2431_p4 = pnand %p2430_p3, %p2424_p0 }
 0x11d   :  { %2373 = vmatpush3.msra.mxu0 %v529_v50  ;;  %2411 = vmatpush3.msra.mxu1 %v561_v51  ;;  %v1925_v50 = vadd.f32 %v1924_v14, %v1923_v12 }
 0x11e   :  { %2374 = vmatprep.subr.mxu0 %v544_v52  ;;  %2412 = vmatprep.subr.mxu1 %v576_v53  ;;  %v741_v53 = vadd.f32 %v1887_v46, %v666_v45 }
 0x11f   :  { %2375 = vmatpush3.msra.mxu0 %v528_v54  ;;  %1708 = vmatprep.mubr.f32.mxu0 %v45_v55 }
 0x120   :  { %2413 = vmatpush3.msra.mxu1 %v560_v56  ;;  %1783 = vmatprep.mubr.f32.mxu1 %v47_v57  ;;  %v886_v56 = vadd.f32 %v1960_v49, %v811_v48  ;;  %v816_v57 = vadd.f32 %v1925_v50, %v741_v53 }
 0x121   :  { %1709 = vmatmul.mubr.f32.vlgmr.msra.gmra.mxu0 %v44_v58  ;;  %1784 = vmatmul.mubr.f32.vlgmr.msra.gmra.mxu1 %v46_v59  ;;  %v1963_v58 = vadd.f32 %v1962_v15, %v1961_v13 }
 0x122   :  { %1713 = vmatprep.mubr.f32.mxu0 %v77_v60  ;;  %1788 = vmatprep.mubr.f32.mxu1 %v79_v61 }
 0x123   :  { %v891_v0 = vadd.f32 %v1963_v58, %v816_v57 }
 0x125   :  { %1714 = vmatmul.mubr.f32.gmra.mxu0 %v76_v62  ;;  %1789 = vmatmul.mubr.f32.gmra.mxu1 %v78_v63 }
 0x12c   :  { %v1996_v16 = vpop.f32.mrf.mxu0 }
 0x12e   :  { %v2034_v17 = vpop.f32.mrf.mxu1  ;;  %v1997_v18 = vpop.f32.mrf.mxu0 }
 0x12f   :  { %v1998_v54 = vadd.f32 %v1997_v18, %v1996_v16 }
 0x130   :  { %v2035_v19 = vpop.f32.mrf.mxu1 }
 0x131   :  { %v961_v60 = vadd.f32 %v1998_v54, %v886_v56  ;;  %v2036_v61 = vadd.f32 %v2035_v19, %v2034_v17 }
 0x132   :  { %v1999_v20 = vpop.f32.mrf.mxu0 }
 0x133   :  { %v1036_v3 = vadd.f32 %v2036_v61, %v961_v60 }
 0x134   :  { %v2000_v22 = vpop.f32.mrf.mxu0 }
 0x135   :  { %v2037_v21 = vpop.f32.mrf.mxu1  ;;  %v2001_v62 = vadd.f32 %v2000_v22, %v1999_v20 }
 0x137   :  { %v2038_v23 = vpop.f32.mrf.mxu1  ;;  %v966_v4 = vadd.f32 %v2001_v62, %v891_v0 }
 0x138   :  { %v2039_v5 = vadd.f32 %v2038_v23, %v2037_v21 }
 0x13a   :  { %v1041_v11 = vadd.f32 %v2039_v5, %v966_v4 }
 0x150   :  { %v2072_v24 = vpop.f32.mrf.mxu0 }
 0x152   :  { %v2110_v25 = vpop.f32.mrf.mxu1  ;;  %v2073_v26 = vpop.f32.mrf.mxu0 }
 0x153   :  { %v2074_v1 = vadd.f32 %v2073_v26, %v2072_v24 }
 0x154   :  { %v2111_v27 = vpop.f32.mrf.mxu1 }
 0x155   :  { %v1111_v7 = vadd.f32 %v2074_v1, %v1036_v3  ;;  %v2112_v8 = vadd.f32 %v2111_v27, %v2110_v25 }
 0x156   :  { %v2075_v28 = vpop.f32.mrf.mxu0 }
 0x157   :  { %v1186_v15 = vadd.f32 %v2112_v8, %v1111_v7 }
 0x158   :  { %v2076_v30 = vpop.f32.mrf.mxu0 }
 0x159   :  { %v2113_v29 = vpop.f32.mrf.mxu1  ;;  %v2077_v9 = vadd.f32 %v2076_v30, %v2075_v28 }
 0x15b   :  { %v2114_v31 = vpop.f32.mrf.mxu1  ;;  %v1116_v16 = vadd.f32 %v2077_v9, %v1041_v11 }
 0x15c   :  { %v2115_v17 = vadd.f32 %v2114_v31, %v2113_v29 }
 0x15e   :  { %v1191_v26 = vadd.f32 %v2115_v17, %v1116_v16 }
 0x174   :  { %v2148_v32 = vpop.f32.mrf.mxu0 }
 0x176   :  { %v2186_v33 = vpop.f32.mrf.mxu1  ;;  %v2149_v36 = vpop.f32.mrf.mxu0 }
 0x177   :  { %v2150_v12 = vadd.f32 %v2149_v36, %v2148_v32 }
 0x178   :  { %v2187_v37 = vpop.f32.mrf.mxu1 }
 0x179   :  { %v1261_v19 = vadd.f32 %v2150_v12, %v1186_v15  ;;  %v2188_v20 = vadd.f32 %v2187_v37, %v2186_v33 }
 0x17a   :  { %v2151_v41 = vpop.f32.mrf.mxu0 }
 0x17b   :  { %v1336_v23 = vadd.f32 %v2188_v20, %v1261_v19 }
 0x17c   :  { %v2152_v47 = vpop.f32.mrf.mxu0 }
 0x17d   :  { %v2189_v43 = vpop.f32.mrf.mxu1  ;;  %v2153_v22 = vadd.f32 %v2152_v47, %v2151_v41 }
 0x17f   :  { %v2190_v51 = vpop.f32.mrf.mxu1  ;;  %v1266_v35 = vadd.f32 %v2153_v22, %v1191_v26 }
 0x180   :  { %v2191_v25 = vadd.f32 %v2190_v51, %v2189_v43 }
 0x182   :  { %v1341_v38 = vadd.f32 %v2191_v25, %v1266_v35 }
 0x198   :  { %v2224_v52 = vpop.f32.mrf.mxu0 }
 0x19a   :  { %v2262_v55 = vpop.f32.mrf.mxu1  ;;  %v2225_v59 = vpop.f32.mrf.mxu0 }
 0x19b   :  { %v2226_v34 = vadd.f32 %v2225_v59, %v2224_v52 }
 0x19c   :  { %v2263_v63 = vpop.f32.mrf.mxu1 }
 0x19d   :  { %v1411_v28 = vadd.f32 %v2226_v34, %v1336_v23  ;;  %v2264_v30 = vadd.f32 %v2263_v63, %v2262_v55 }
 0x19e   :  { %v2227_v2 = vpop.f32.mrf.mxu0 }
 0x19f   :  { %v1486_v29 = vadd.f32 %v2264_v30, %v1411_v28 }
 0x1a0   :  { %v2228_v10 = vpop.f32.mrf.mxu0 }
 0x1a1   :  { %v2229_v32 = vadd.f32 %v2228_v10, %v2227_v2 }
 0x1a2   :  { %v2265_v6 = vpop.f32.mrf.mxu1 }
 0x1a3   :  { %v1416_v31 = vadd.f32 %v2229_v32, %v1341_v38 }
 0x1a4   :  { %v2266_v14 = vpop.f32.mrf.mxu1 }
 0x1a5   :  { %v2267_v42 = vadd.f32 %v2266_v14, %v2265_v6 }
 0x1a7   :  { %v1491_v47 = vadd.f32 %v2267_v42, %v1416_v31 }
 0x1bc   :  { %v2300_v13 = vpop.f32.mrf.mxu0 }
 0x1be   :  { %v2338_v18 = vpop.f32.mrf.mxu1  ;;  %v2301_v24 = vpop.f32.mrf.mxu0 }
 0x1bf   :  { %v2302_v39 = vadd.f32 %v2301_v24, %v2300_v13 }
 0x1c0   :  { %v2339_v21 = vpop.f32.mrf.mxu1 }
 0x1c1   :  { %v1561_v37 = vadd.f32 %v2302_v39, %v1486_v29  ;;  %v2340_v41 = vadd.f32 %v2339_v21, %v2338_v18 }
 0x1c2   :  { %v2303_v27 = vpop.f32.mrf.mxu0 }
 0x1c3   :  { %v1636_v49 = vadd.f32 %v2340_v41, %v1561_v37 }
 0x1c4   :  { %v2304_v40 = vpop.f32.mrf.mxu0 }
 0x1c5   :  { %v2305_v44 = vadd.f32 %v2304_v40, %v2303_v27 }
 0x1c6   :  { %v2341_v36 = vpop.f32.mrf.mxu1 }
 0x1c7   :  { %v1566_v50 = vadd.f32 %v2305_v44, %v1491_v47 }
 0x1c8   :  { %v2342_v33 = vpop.f32.mrf.mxu1 }
 0x1c9   :  { %v2343_v51 = vadd.f32 %v2342_v33, %v2341_v36 }
 0x1cb   :  { %v1641_v59 = vadd.f32 %v2343_v51, %v1566_v50 }
 0x1e1   :  { %v2376_v45 = vpop.f32.mrf.mxu0  ;;  %v2414_v46 = vpop.f32.mrf.mxu1 }
 0x1e3   :  { %v2377_v48 = vpop.f32.mrf.mxu0  ;;  %v2415_v43 = vpop.f32.mrf.mxu1 }
 0x1e4   :  { %v2378_v52 = vadd.f32 %v2377_v48, %v2376_v45  ;;  %v2416_v56 = vadd.f32 %v2415_v43, %v2414_v46 }
 0x1e5   :  { %v2379_v53 = vpop.f32.mrf.mxu0  ;;  %v2417_v54 = vpop.f32.mrf.mxu1 }
 0x1e6   :  { %v1711_v55 = vadd.f32 %v2378_v52, %v1636_v49 }
 0x1e7   :  { %v2380_v57 = vpop.f32.mrf.mxu0  ;;  %v2418_v58 = vpop.f32.mrf.mxu1 }
 0x1e8   :  { %v1786_v60 = vadd.f32 %v2416_v56, %v1711_v55  ;;  %v2381_v61 = vadd.f32 %v2380_v57, %v2379_v53  ;;  %v2419_v63 = vadd.f32 %v2418_v58, %v2417_v54 }
 0x1ea   :  { %1794 = vst [vmem:[#allocation3] sm:$0xff] %v1786_v60  ;;  %v1716_v62 = vadd.f32 %v2381_v61, %v1641_v59 }
 0x1ec   :  { %v1791_v0 = vadd.f32 %v2419_v63, %v1716_v62 }
 0x1ee   :  { %1795 = vst [vmem:[#allocation3 + $0x8] sm:$0xff] %v1791_v0 }
 0x1ef   :  { %2434 = shalt.err (!%p2431_p4)
}
 0x1f0   :  { %s2446_s5 = smov 128   ;;  %s2447_s6 = smov 8  }
 0x1f1   :  { %1807 = dma.vmem_to_hbm [thread:$0]  %s1802_s30, 256, %s4205_s3, [#allocation4], %s2446_s5, %s2446_s5, %s2447_s6  }
 0x1f2   :  { %2443 = dma.done.wait [#allocation4], 256  }
 0x1f3   :  { %2444 = vsyncadd [#allocation4], 4294967040 }
 0x1f4   :  { %1811 = vsyncpa [#allocation4], 1 }

</bundles_post_ra>
